<compile_context>
chip_gen: v5e
topology: v5e:2x2
jax: 0.10.0
libtpu: 0.0.40
codegen_flags: <defaults>
</compile_context>

<pallas_src>
import math
import functools

import numpy as np
import jax
import jax.numpy as jnp
from jax import lax
from jax.experimental import pallas as pl
from jax.experimental.pallas import tpu as pltpu


def lsh_attention_kernel(x_ref, wq_ref, bq_ref, wv_ref, bv_ref, hpw_ref, hpb_ref,
                         out_ref, *, num_heads, head_dim, n_hyperplanes,
                         n_buckets, embedding_dim, seq_len):
    # x_ref:   [1, S, E]   f32 (one batch row; cast to bf16 in-kernel)
    # wq_ref:  [E, E]      bf16 (transposed Linear weight)
    # bq_ref:  [1, E]      f32
    # wv_ref:  [E, E]      bf16
    # bv_ref:  [1, E]      f32
    # hpw_ref: [D, Y]      bf16 (hyperplane directions, shared across heads)
    # hpb_ref: [1, Y]      f32  (hyperplane "ones-row" bias)
    # out_ref: [1, S, E]   f32
    H, D, Y, S = num_heads, head_dim, n_hyperplanes, seq_len
    f32 = jnp.float32
    bf16 = jnp.bfloat16

    x = x_ref[0].astype(bf16)                                            # [S, E]

    # nn.Linear projections for all heads at once: y = x @ W^T + b
    # (bf16 operands on the MXU, f32 accumulation).
    q = jnp.dot(x, wq_ref[...], preferred_element_type=f32) + bq_ref[...]   # [S, E] f32
    v = jnp.dot(x, wv_ref[...], preferred_element_type=f32) + bv_ref[...]   # [S, E] f32

    # Head-batched layout [H, S, D]: one reshape+transpose per array
    # (no per-head lane slicing), MXU operands cast once.
    qh = jnp.transpose(q.reshape(S, H, D), (1, 0, 2)).astype(bf16)          # [H, S, D]
    vh = jnp.transpose(v.reshape(S, H, D), (1, 0, 2)).astype(bf16)          # [H, S, D]

    # LSH bucket bits: proj[h, s, y] = q_head_h[s] @ hp[:, y] + hp_bias[y].
    proj = jnp.einsum('hsd,dy->hsy', qh, hpw_ref[...],
                      preferred_element_type=f32) + hpb_ref[...]            # [H, S, Y]
    # Signed bits (+1 if bit set, -1 otherwise); exact in bf16.
    sgn = jnp.where(proj >= 0.0, 1.0, -1.0).astype(bf16)                    # [H, S, Y]

    # Batched per-head raw scores and bucket agreement (single MXU push each).
    scores = jnp.einsum('hqd,hkd->hqk', qh, qh,
                        preferred_element_type=f32)                         # [H, S, S]
    agree = jnp.einsum('hqy,hky->hqk', sgn, sgn,
                       preferred_element_type=f32)                          # [H, S, S]
    # agree == Y iff same bucket. Reference sums C per-bucket masked q@q^T maps:
    #   sum == (q @ q^T) * (n_buckets - 1 - [bucket_i != bucket_j])
    diff = (agree < (float(Y) - 0.5)).astype(f32)
    count = (float(n_buckets) - 1.0) - diff
    inv_sqrt_e = 1.0 / math.sqrt(float(embedding_dim))
    scores = scores * (count * inv_sqrt_e)

    # Softmax over keys (f32 math; exp on EUP, approx reciprocal on EUP).
    m = jnp.max(scores, axis=-1, keepdims=True)
    e = jnp.exp(scores - m)
    attn = e * pl.reciprocal(jnp.sum(e, axis=-1, keepdims=True), approx=True)
    attn = attn.astype(bf16)                                                # [H, S, S]

    # attn @ v for all heads, then ONE lane-dense [S, E] store.
    oh = jnp.einsum('hqk,hkd->hqd', attn, vh,
                    preferred_element_type=f32)                             # [H, S, D]
    o = jnp.transpose(oh, (1, 0, 2)).reshape(S, H * D)                      # [S, E]
    out_ref[0, :, :] = o.astype(out_ref.dtype)


def prepare_params(wq, bq, wv, bv, hyperplanes, *, num_heads, n_buckets):
    """One-time parameter re-layout (hoisted out of the forward hot path)."""
    E = wq.shape[0]
    H = num_heads
    assert E % H == 0, "embedding_dim must be divisible by num_heads"
    D = E // H
    Y = int(math.log2(n_buckets))   # matches the module: rounds down to prev pow2
    bf16 = jnp.bfloat16

    wqT = jnp.asarray(wq).T.astype(bf16)                       # [E, E]
    wvT = jnp.asarray(wv).T.astype(bf16)                       # [E, E]
    bq2 = jnp.asarray(bq, jnp.float32).reshape(1, E)           # [1, E]
    bv2 = jnp.asarray(bv, jnp.float32).reshape(1, E)           # [1, E]

    hp = jnp.asarray(hyperplanes)
    hp_w = hp[:D].astype(bf16)                                 # [D, Y]
    hp_b = hp[D].astype(jnp.float32).reshape(1, Y)             # [1, Y]
    return wqT, bq2, wvT, bv2, hp_w, hp_b


@functools.partial(jax.jit, static_argnames=("num_heads", "n_buckets"))
def lsh_attention(x, wqT, bq, wvT, bv, hp_w, hp_b, *, num_heads, n_buckets):
    """x: [B, S, E] f32; remaining args come from prepare_params()."""
    B, S, E = x.shape
    H = num_heads
    D = E // H
    Y = int(math.log2(n_buckets))

    kernel = functools.partial(
        lsh_attention_kernel,
        num_heads=H, head_dim=D, n_hyperplanes=Y,
        n_buckets=n_buckets, embedding_dim=E, seq_len=S)

    out = pl.pallas_call(
        kernel,
        out_shape=jax.ShapeDtypeStruct((B, S, E), jnp.float32),
        grid=(B,),
        in_specs=[
            pl.BlockSpec((1, S, E), lambda b: (b, 0, 0)),   # x (this batch row, f32)
            pl.BlockSpec((E, E), lambda b: (0, 0)),         # wq^T
            pl.BlockSpec((1, E), lambda b: (0, 0)),         # bq
            pl.BlockSpec((E, E), lambda b: (0, 0)),         # wv^T
            pl.BlockSpec((1, E), lambda b: (0, 0)),         # bv
            pl.BlockSpec((D, Y), lambda b: (0, 0)),         # hyperplane directions
            pl.BlockSpec((1, Y), lambda b: (0, 0)),         # hyperplane bias row
        ],
        out_specs=pl.BlockSpec((1, S, E), lambda b: (b, 0, 0)),
        compiler_params=pltpu.CompilerParams(
            dimension_semantics=("parallel",),
            vmem_limit_bytes=32 * 1024 * 1024),
    )(x, wqT, bq, wvT, bv, hp_w, hp_b)
    return out


def lsh_attention_reference(x, wq, bq, wv, bv, hyperplanes, *, num_heads, n_buckets):
    """Pure-JAX port of the PyTorch forward (same masked-per-bucket structure).

    Matmul inputs are cast to bf16 with f32 accumulation, matching the kernel's
    MXU precision, so the bucket bits and scores are directly comparable.
    """
    B, S, E = x.shape
    H = num_heads
    D = E // H
    Y = int(math.log2(n_buckets))
    bf16 = jnp.bfloat16
    f32 = jnp.float32

    q = jnp.dot(x.astype(bf16), jnp.asarray(wq).T.astype(bf16),
                preferred_element_type=f32) + bq
    v = jnp.dot(x.astype(bf16), jnp.asarray(wv).T.astype(bf16),
                preferred_element_type=f32) + bv
    q = q.reshape(B, S, H, D)
    v = v.reshape(B, S, H, D)

    # get_buckets: cat([q, 1]) @ hyperplanes == q @ hp[:D] + hp[D]
    proj = jnp.einsum('bnhd,dy->bnhy', q.astype(bf16),
                      jnp.asarray(hyperplanes)[:D].astype(bf16),
                      preferred_element_type=f32) + jnp.asarray(hyperplanes)[D]
    bits = (proj >= 0).astype(f32)
    buckets = jnp.einsum('bnhy,y->bnh', bits, 2.0 ** jnp.arange(Y, dtype=f32))

    qt = q.transpose(0, 2, 1, 3)   # [B, H, S, D]
    vt = v.transpose(0, 2, 1, 3)
    onehot = jax.nn.one_hot(buckets.astype(jnp.int32), n_buckets, dtype=jnp.int32)
    onehot = jnp.einsum('bnhc->cbhn', onehot)                        # [C, B, H, S]
    qm = jnp.where(onehot.astype(bool)[..., None], 0.0, qt[None].astype(bf16))
    attn = jnp.einsum('cbhsd,cbhtd->cbhst', qm, qm,
                      preferred_element_type=f32) / math.sqrt(E)
    attn = attn.sum(axis=0)
    attn = jax.nn.softmax(attn, axis=-1)
    out = jnp.einsum('bhst,bhtd->bhsd', attn.astype(bf16), vt.astype(bf16),
                     preferred_element_type=f32)
    return out.transpose(0, 2, 1, 3).reshape(B, S, E)


if __name__ == "__main__":
    # Small shapes consistent with the module: embedding_dim=32, num_heads=4.
    B, S, E, H = 2, 16, 32, 4
    n_buckets = 32                       # -> 5 hyperplanes
    D = E // H
    Y = int(math.log2(n_buckets))

    key = jax.random.PRNGKey(0)
    kx, kwq, kbq, kwv, kbv, khp = jax.random.split(key, 6)
    bound = 1.0 / math.sqrt(E)           # nn.Linear default init range
    wq = jax.random.uniform(kwq, (E, E), jnp.float32, -bound, bound)
    bq = jax.random.uniform(kbq, (E,), jnp.float32, -bound, bound)
    wv = jax.random.uniform(kwv, (E, E), jnp.float32, -bound, bound)
    bv = jax.random.uniform(kbv, (E,), jnp.float32, -bound, bound)
    hyperplanes = jax.random.normal(khp, (D + 1, Y), jnp.float32)   # torch.randn analogue
    x = jax.random.normal(kx, (B, S, E), jnp.float32)

    # One-time parameter re-layout (outside the jitted forward).
    params = prepare_params(wq, bq, wv, bv, hyperplanes,
                            num_heads=H, n_buckets=n_buckets)

    out = lsh_attention(x, *params, num_heads=H, n_buckets=n_buckets)
    out = jax.block_until_ready(out)

    ref = lsh_attention_reference(x, wq, bq, wv, bv, hyperplanes,
                                  num_heads=H, n_buckets=n_buckets)
    assert out.shape == (B, S, E)
    np.testing.assert_allclose(np.asarray(out), np.asarray(ref), atol=2e-2, rtol=2e-2)
    print("KERNEL_OK")
</pallas_src>

<mosaic_0001>
module attributes {stable_mosaic.version = 11 : i64} {
  func.func @lsh_attention_kernel(%arg0: i32, %arg1: memref<1x16x32xf32, #tpu.memory_space<vmem>>, %arg2: memref<32x32xbf16, #tpu.memory_space<vmem>>, %arg3: memref<1x32xf32, #tpu.memory_space<vmem>>, %arg4: memref<32x32xbf16, #tpu.memory_space<vmem>>, %arg5: memref<1x32xf32, #tpu.memory_space<vmem>>, %arg6: memref<8x5xbf16, #tpu.memory_space<vmem>>, %arg7: memref<1x5xf32, #tpu.memory_space<vmem>>, %arg8: memref<1x16x32xf32, #tpu.memory_space<vmem>>) attributes {dimension_semantics = [#tpu.dimension_semantics<parallel>], iteration_bounds = array<i64: 2>, scalar_prefetch = 0 : i64, scratch_operands = 0 : i64, tpu.core_type = #tpu.core_type<tc>, window_params = [{transform_indices = @transform_0, window_bounds = array<i64: 1, 16, 32>}, {pipeline_mode = #tpu.pipeline_mode<synchronous>, transform_indices = @transform_1, window_bounds = array<i64: 32, 32>}, {pipeline_mode = #tpu.pipeline_mode<synchronous>, transform_indices = @transform_2, window_bounds = array<i64: 1, 32>}, {pipeline_mode = #tpu.pipeline_mode<synchronous>, transform_indices = @transform_3, window_bounds = array<i64: 32, 32>}, {pipeline_mode = #tpu.pipeline_mode<synchronous>, transform_indices = @transform_4, window_bounds = array<i64: 1, 32>}, {pipeline_mode = #tpu.pipeline_mode<synchronous>, transform_indices = @transform_5, window_bounds = array<i64: 8, 5>}, {pipeline_mode = #tpu.pipeline_mode<synchronous>, transform_indices = @transform_6, window_bounds = array<i64: 1, 5>}, {transform_indices = @transform_7, window_bounds = array<i64: 1, 16, 32>}]} {
    %c0 = arith.constant 0 : index
    %c0_0 = arith.constant 0 : index
    %c0_1 = arith.constant 0 : index
    %0 = vector.load %arg1[%c0, %c0_0, %c0_1] : memref<1x16x32xf32, #tpu.memory_space<vmem>>, vector<1x16x32xf32>
    %1 = vector.shape_cast %0 : vector<1x16x32xf32> to vector<16x32xf32>
    %2 = arith.truncf %1 : vector<16x32xf32> to vector<16x32xbf16>
    %c0_2 = arith.constant 0 : index
    %c0_3 = arith.constant 0 : index
    %3 = vector.load %arg2[%c0_2, %c0_3] : memref<32x32xbf16, #tpu.memory_space<vmem>>, vector<32x32xbf16>
    %cst = arith.constant dense<0.000000e+00> : vector<16x32xf32>
    %4 = tpu.matmul %2, %3, %cst {dimension_numbers = #tpu.dot_dimension_numbers<[1], [0], [0], [1], [0, 0, 1, 1], [], []>} : vector<16x32xbf16>, vector<32x32xbf16>, vector<16x32xf32> -> vector<16x32xf32>
    %c0_4 = arith.constant 0 : index
    %c0_5 = arith.constant 0 : index
    %5 = vector.load %arg3[%c0_4, %c0_5] : memref<1x32xf32, #tpu.memory_space<vmem>>, vector<1x32xf32>
    %6 = vector.broadcast %5 : vector<1x32xf32> to vector<16x32xf32>
    %7 = arith.addf %4, %6 : vector<16x32xf32>
    %c0_6 = arith.constant 0 : index
    %c0_7 = arith.constant 0 : index
    %8 = vector.load %arg4[%c0_6, %c0_7] : memref<32x32xbf16, #tpu.memory_space<vmem>>, vector<32x32xbf16>
    %cst_8 = arith.constant dense<0.000000e+00> : vector<16x32xf32>
    %9 = tpu.matmul %2, %8, %cst_8 {dimension_numbers = #tpu.dot_dimension_numbers<[1], [0], [0], [1], [0, 0, 1, 1], [], []>} : vector<16x32xbf16>, vector<32x32xbf16>, vector<16x32xf32> -> vector<16x32xf32>
    %c0_9 = arith.constant 0 : index
    %c0_10 = arith.constant 0 : index
    %10 = vector.load %arg5[%c0_9, %c0_10] : memref<1x32xf32, #tpu.memory_space<vmem>>, vector<1x32xf32>
    %11 = vector.broadcast %10 : vector<1x32xf32> to vector<16x32xf32>
    %12 = arith.addf %9, %11 : vector<16x32xf32>
    %13 = vector.shape_cast %7 : vector<16x32xf32> to vector<16x4x8xf32>
    %14 = tpu.transpose %13, [1, 0, 2] : vector<16x4x8xf32> -> vector<4x16x8xf32>
    %15 = arith.truncf %14 : vector<4x16x8xf32> to vector<4x16x8xbf16>
    %16 = vector.shape_cast %12 : vector<16x32xf32> to vector<16x4x8xf32>
    %17 = tpu.transpose %16, [1, 0, 2] : vector<16x4x8xf32> -> vector<4x16x8xf32>
    %18 = arith.truncf %17 : vector<4x16x8xf32> to vector<4x16x8xbf16>
    %c0_11 = arith.constant 0 : index
    %c0_12 = arith.constant 0 : index
    %19 = vector.load %arg6[%c0_11, %c0_12] : memref<8x5xbf16, #tpu.memory_space<vmem>>, vector<8x5xbf16>
    "tpu.trace_start"() <{level = 10 : i32, message = "hsd,dy->hsy"}> : () -> ()
    %cst_13 = arith.constant dense<0.000000e+00> : vector<4x16x5xf32>
    %20 = tpu.matmul %15, %19, %cst_13 {dimension_numbers = #tpu.dot_dimension_numbers<[2], [0], [0, 1], [1], [0, 0, 0, 1, 1, 1], [], []>} : vector<4x16x8xbf16>, vector<8x5xbf16>, vector<4x16x5xf32> -> vector<4x16x5xf32>
    "tpu.trace_stop"() : () -> ()
    %c0_14 = arith.constant 0 : index
    %c0_15 = arith.constant 0 : index
    %21 = vector.load %arg7[%c0_14, %c0_15] : memref<1x5xf32, #tpu.memory_space<vmem>>, vector<1x5xf32>
    %22 = vector.shape_cast %21 : vector<1x5xf32> to vector<1x1x5xf32>
    %23 = vector.broadcast %22 : vector<1x1x5xf32> to vector<4x16x5xf32>
    %24 = arith.addf %20, %23 : vector<4x16x5xf32>
    %cst_16 = arith.constant 0.000000e+00 : f32
    %25 = vector.broadcast %cst_16 : f32 to vector<4x16x5xf32>
    %26 = arith.cmpf oge, %24, %25 : vector<4x16x5xf32>
    %cst_17 = arith.constant 1.000000e+00 : f32
    %cst_18 = arith.constant -1.000000e+00 : f32
    %27 = vector.broadcast %cst_17 : f32 to vector<4x16x5xf32>
    %28 = vector.broadcast %cst_18 : f32 to vector<4x16x5xf32>
    %29 = arith.select %26, %27, %28 : vector<4x16x5xi1>, vector<4x16x5xf32>
    %30 = arith.truncf %29 : vector<4x16x5xf32> to vector<4x16x5xbf16>
    "tpu.trace_start"() <{level = 10 : i32, message = "hqd,hkd->hqk"}> : () -> ()
    %cst_19 = arith.constant dense<0.000000e+00> : vector<4x16x16xf32>
    %31 = tpu.matmul %15, %15, %cst_19 {dimension_numbers = #tpu.dot_dimension_numbers<[2], [2], [1], [1], [0, 0, 0, 1, 1, 1], [0], [0]>} : vector<4x16x8xbf16>, vector<4x16x8xbf16>, vector<4x16x16xf32> -> vector<4x16x16xf32>
    "tpu.trace_stop"() : () -> ()
    "tpu.trace_start"() <{level = 10 : i32, message = "hqy,hky->hqk"}> : () -> ()
    %cst_20 = arith.constant dense<0.000000e+00> : vector<4x16x16xf32>
    %32 = tpu.matmul %30, %30, %cst_20 {dimension_numbers = #tpu.dot_dimension_numbers<[2], [2], [1], [1], [0, 0, 0, 1, 1, 1], [0], [0]>} : vector<4x16x5xbf16>, vector<4x16x5xbf16>, vector<4x16x16xf32> -> vector<4x16x16xf32>
    %cst_21 = arith.constant 4.500000e+00 : f32
    "tpu.trace_stop"() : () -> ()
    %33 = vector.broadcast %cst_21 : f32 to vector<4x16x16xf32>
    %34 = arith.cmpf olt, %32, %33 : vector<4x16x16xf32>
    %35 = arith.extui %34 : vector<4x16x16xi1> to vector<4x16x16xi32>
    %36 = arith.sitofp %35 : vector<4x16x16xi32> to vector<4x16x16xf32>
    %cst_22 = arith.constant 3.100000e+01 : f32
    %37 = vector.broadcast %cst_22 : f32 to vector<4x16x16xf32>
    %38 = arith.subf %37, %36 : vector<4x16x16xf32>
    %cst_23 = arith.constant 0.176776692 : f32
    %39 = vector.broadcast %cst_23 : f32 to vector<4x16x16xf32>
    %40 = arith.mulf %38, %39 : vector<4x16x16xf32>
    %41 = arith.mulf %31, %40 : vector<4x16x16xf32>
    %cst_24 = arith.constant dense<0xFF800000> : vector<4x16xf32>
    %42 = vector.multi_reduction <maximumf>, %41, %cst_24 [2] : vector<4x16x16xf32> to vector<4x16xf32>
    %43 = vector.shape_cast %42 : vector<4x16xf32> to vector<4x16x1xf32>
    %44 = vector.broadcast %43 : vector<4x16x1xf32> to vector<4x16x16xf32>
    %45 = arith.subf %41, %44 : vector<4x16x16xf32>
    %46 = math.exp %45 : vector<4x16x16xf32>
    %cst_25 = arith.constant dense<0.000000e+00> : vector<4x16xf32>
    %47 = vector.multi_reduction <add>, %46, %cst_25 [2] : vector<4x16x16xf32> to vector<4x16xf32>
    %48 = vector.shape_cast %47 : vector<4x16xf32> to vector<4x16x1xf32>
    %49 = tpu.reciprocal %48 {approx = true} : vector<4x16x1xf32> -> vector<4x16x1xf32>
    %50 = vector.broadcast %49 : vector<4x16x1xf32> to vector<4x16x16xf32>
    %51 = arith.mulf %46, %50 : vector<4x16x16xf32>
    %52 = arith.truncf %51 : vector<4x16x16xf32> to vector<4x16x16xbf16>
    "tpu.trace_start"() <{level = 10 : i32, message = "hqk,hkd->hqd"}> : () -> ()
    %cst_26 = arith.constant dense<0.000000e+00> : vector<4x16x8xf32>
    %53 = tpu.matmul %52, %18, %cst_26 {dimension_numbers = #tpu.dot_dimension_numbers<[2], [1], [1], [2], [0, 0, 0, 1, 1, 2], [0], [0]>} : vector<4x16x16xbf16>, vector<4x16x8xbf16>, vector<4x16x8xf32> -> vector<4x16x8xf32>
    "tpu.trace_stop"() : () -> ()
    %54 = tpu.transpose %53, [1, 0, 2] : vector<4x16x8xf32> -> vector<16x4x8xf32>
    %55 = vector.shape_cast %54 : vector<16x4x8xf32> to vector<16x32xf32>
    %c0_27 = arith.constant 0 : index
    %c0_28 = arith.constant 0 : index
    %c0_29 = arith.constant 0 : index
    %56 = vector.load %arg8[%c0_27, %c0_28, %c0_29] : memref<1x16x32xf32, #tpu.memory_space<vmem>>, vector<1x16x32xf32>
    %57 = vector.shape_cast %56 : vector<1x16x32xf32> to vector<16x32xf32>
    %58 = vector.shape_cast %55 : vector<16x32xf32> to vector<1x16x32xf32>
    tpu.vector_store %arg8[%c0_27, %c0_28, %c0_29], %58 {strides = array<i32>} : memref<1x16x32xf32, #tpu.memory_space<vmem>>, vector<1x16x32xf32>,
    return
  }
  func.func @transform_0(%arg0: i32) -> (i32, i32, i32) {
    %c0_i32 = arith.constant 0 : i32
    %c0_i32_0 = arith.constant 0 : i32
    %c0_i32_1 = arith.constant 0 : i32
    return %arg0, %c0_i32, %c0_i32_0 : i32, i32, i32
  }
  func.func @transform_1(%arg0: i32) -> (i32, i32) {
    %c0_i32 = arith.constant 0 : i32
    %c0_i32_0 = arith.constant 0 : i32
    %c0_i32_1 = arith.constant 0 : i32
    return %c0_i32, %c0_i32_0 : i32, i32
  }
  func.func @transform_2(%arg0: i32) -> (i32, i32) {
    %c0_i32 = arith.constant 0 : i32
    %c0_i32_0 = arith.constant 0 : i32
    %c0_i32_1 = arith.constant 0 : i32
    return %c0_i32, %c0_i32_0 : i32, i32
  }
  func.func @transform_3(%arg0: i32) -> (i32, i32) {
    %c0_i32 = arith.constant 0 : i32
    %c0_i32_0 = arith.constant 0 : i32
    %c0_i32_1 = arith.constant 0 : i32
    return %c0_i32, %c0_i32_0 : i32, i32
  }
  func.func @transform_4(%arg0: i32) -> (i32, i32) {
    %c0_i32 = arith.constant 0 : i32
    %c0_i32_0 = arith.constant 0 : i32
    %c0_i32_1 = arith.constant 0 : i32
    return %c0_i32, %c0_i32_0 : i32, i32
  }
  func.func @transform_5(%arg0: i32) -> (i32, i32) {
    %c0_i32 = arith.constant 0 : i32
    %c0_i32_0 = arith.constant 0 : i32
    %c0_i32_1 = arith.constant 0 : i32
    return %c0_i32, %c0_i32_0 : i32, i32
  }
  func.func @transform_6(%arg0: i32) -> (i32, i32) {
    %c0_i32 = arith.constant 0 : i32
    %c0_i32_0 = arith.constant 0 : i32
    %c0_i32_1 = arith.constant 0 : i32
    return %c0_i32, %c0_i32_0 : i32, i32
  }
  func.func @transform_7(%arg0: i32) -> (i32, i32, i32) {
    %c0_i32 = arith.constant 0 : i32
    %c0_i32_0 = arith.constant 0 : i32
    %c0_i32_1 = arith.constant 0 : i32
    return %arg0, %c0_i32, %c0_i32_0 : i32, i32, i32
  }
}

</mosaic_0001>

<bundles_post_ra>
// kernel: lsh_attention.1
= control target key start
LH: loop header
LB: loop body
LE: loop exit
PB: predicated region body
PF: predicated region fallthrough
CT: control target
= control target key end

     0   :  { %s2875_s0 = inlined_call_operand.hbm [shape: f32[2,16,32], index: 0, kind: input, shape index: {}]   ;;  %s2876_s1 = inlined_call_operand.hbm [shape: bf16[32,32], index: 1, kind: input, shape index: {}]   ;;  %s2877_s2 = inlined_call_operand.hbm [shape: f32[1,32], index: 2, kind: input, shape index: {}]   ;;  %s2878_s3 = inlined_call_operand.hbm [shape: bf16[32,32], index: 3, kind: input, shape index: {}]   ;;  %s2879_s4 = inlined_call_operand.hbm [shape: f32[1,32], index: 4, kind: input, shape index: {}]   ;;  %s2880_s5 = inlined_call_operand.vmem [shape: bf16[8,5], index: 5, kind: input, shape index: {}]   ;;  %s2881_s6 = inlined_call_operand.vmem [shape: f32[1,5], index: 6, kind: input, shape index: {}]   ;;  %s2882_s7 = inlined_call_operand.hbm [shape: f32[2,16,32], index: 7, kind: output, shape index: {}]  }
   0x1   :  { %2883 = sst [smem:[#allocation16_spill]] %s2876_s1 }
   0x2   :  { %12 = vsyncpa [#allocation3], 0 }
   0x3   :  { %14 = vsyncpa [#allocation3 + $0x1], 0 }
   0x4   :  { %15 = vsyncpa [#allocation6], 0 }
   0x5   :  { %16 = vsyncpa [#allocation9], 0 }
   0x6   :  { %17 = vsyncpa [#allocation4], 0 }
   0x7   :  { %19 = vsyncpa [#allocation4 + $0x1], 0  ;;  %s2333_s24 = smov 0   ;;  %s2335_s25 = smov 0  }
   0x8   :  { %s2337_s26 = smov 0   ;;  %s2339_s27 = smov 0  }
   0x9 LB: > { %s2354_s28 = sadd.s32 4294967295, %s2272_s27   ;;  %s1811_s29 = sadd.s32 4294967294, %s2272_s27   ;;  %s2272_s27 = sphi %s2339_s27, %s2895_s27   ;;  %s2268_s26 = sphi %s2337_s26, %s2894_s26   ;;  %s2264_s25 = sphi %s2335_s25, %s2893_s25   ;;  %s2260_s24 = sphi %s2333_s24, %s2892_s24  }
   0xa   : > { %p45_p0 = scmp.ne.s32.totalorder %s2264_s25, %s2260_s24  ;;  %p46_p1 = scmp.eq.s32.totalorder %s2354_s28, 0 }
   0xb   : > { %p195_p2 = scmp.eq.s32.totalorder %s2354_s28, 1  ;;  %p201_p3 = scmp.eq.s32.totalorder %s1811_s29, 1 }
   0xc   : > { %p2363_p4 = por %p46_p1, %p45_p0  ;;  %p1812_p5 = scmp.ge.s32.totalorder %s2272_s27, 1 }
   0xd   : > { %p2368_p6 = por %p201_p3, %p45_p0  ;;  %p208_p7 = scmp.lt.s32.totalorder %s2272_s27, 3 }
   0xe   : > { %s2886_s1 = sld [smem:[#allocation16_spill]]  ;;  %s2274_s13 = smov [#allocation5]  }
   0xf   : > { %p2376_p8 = pnand %p1812_p5, %p208_p7  ;;  %s221_s14 = sshll.u32 %s2274_s13, 4  ;;  %s222_s14 = int_to_ptr.vmem [resolvable:$true] %s221_s14 }
  0x10   : > { %s245_s18 = sshll.u32 %s2878_s3, 4  ;;  %s2275_s19 = smov 64   ;;  %s246_s18 = int_to_ptr.hbm [resolvable:$true] %s245_s18 }
  0x11   : > { %p1901_p9 = pneg %p2376_p8  ;;  %s2276_s20 = smov 4  }
  0x12   : > { %s2277_s21 = smov [#allocation8]   ;;  %s234_s9 = sshll.u32 %s2877_s2, 4  ;;  %s235_s9 = int_to_ptr.hbm [resolvable:$true] %s234_s9 }
  0x13   : > { %p2384_p10 = pnand %p1901_p9, %p46_p1  ;;  %s247_s22 = sshll.u32 %s2277_s21, 4  ;;  %s248_s22 = int_to_ptr.vmem [resolvable:$true] %s247_s22 }
  0x14   : > { %s219_s11 = sshll.u32 %s2886_s1, 4  ;;  %s2279_s17 = smov [#allocation10]   ;;  %s220_s11 = int_to_ptr.hbm [resolvable:$true] %s219_s11 }
  0x15   : > { %1904 = dma.hbm_to_vmem [thread:$0]  (!%p2384_p10), %s220_s11, 256, %s222_s14, [#allocation6], %s2275_s19, %s2275_s19, %s2276_s20  }
  0x16   : > { %1910 = dma.hbm_to_vmem [thread:$0]  (!%p2384_p10), %s246_s18, 256, %s248_s22, [#allocation9], %s2275_s19, %s2275_s19, %s2276_s20  }
  0x17   : > { %s260_s11 = sshll.u32 %s2879_s4, 4  ;;  %s2278_s14 = smov [#allocation7]   ;;  %s261_s11 = int_to_ptr.hbm [resolvable:$true] %s260_s11 }
  0x18   : > { %s236_s16 = sshll.u32 %s2278_s14, 4  ;;  %s262_s21 = sshll.u32 %s2279_s17, 4  ;;  %s237_s16 = int_to_ptr.vmem [resolvable:$true] %s236_s16  ;;  %s263_s21 = int_to_ptr.vmem [resolvable:$true] %s262_s21 }
  0x19   : > { %1907 = dma.hbm_to_vmem [thread:$0]  (!%p2384_p10), %s235_s9, 16, %s237_s16, [#allocation6]  }
  0x1a   : > { %1913 = dma.hbm_to_vmem [thread:$0]  (!%p2384_p10), %s261_s11, 16, %s263_s21, [#allocation9]  }
  0x1b   : > { %s2407_s18 = sadd.s32 1, %s2272_s27   ;;  %s32_s19 = sadd.s32 1, %s2268_s26 }
  0x1c   : > { %s29_s20 = ssub.s32 %s2272_s27, %s2407_s18  ;;  %p39_p12 = scmp.ne.s32.totalorder %s2268_s26, %s2264_s25 }
  0x1d   : > { %p30_p13 = scmp.eq.s32.totalorder %s29_s20, 0  ;;  %p40_p0 = scmp.eq.s32.totalorder %s2272_s27, 0 }
  0x1e   : > { %p2417_p3 = por %p195_p2, %p39_p12  ;;  %p1926_p5 = scmp.lt.s32.totalorder %s2272_s27, 2 }
  0x1f   : > { %s2423_s23 = scalar_select %p30_p13, %s2268_s26, %s32_s19  }
  0x20   : > { %p41_p7 = por %p40_p0, %p39_p12  ;;  %s279_s29 = sand.u32 1, %s2268_s26  }
  0x21   : > { %s1818_s15 = sshll.u32 %s279_s29, 4  ;;  %s1875_s9 = sshll.u32 %s2272_s27, 4 }
  0x22   : > { %s288_s11 = scalar_lea.hbm %s2875_s0, %s1875_s9  ;;  %s283_s14 = scalar_lea.vmem [#allocation2], %s1818_s15 }
  0x23   : > { %s291_s16 = sshll.u32 %s283_s14, 4  ;;  %s289_s17 = sshll.u32 %s288_s11, 4  ;;  %s292_s16 = int_to_ptr.vmem [resolvable:$true] %s291_s16  ;;  %s290_s17 = int_to_ptr.hbm [resolvable:$true] %s289_s17 }
  0x24   : > { %p2430_p2 = pnand %p1926_p5, %p41_p7  ;;  %s280_s19 = scalar_lea.sflag [#allocation3], %s279_s29 }
  0x25   : > { %s2168_s20 = sshra.s32 %s290_s17, 4  ;;  %s2175_s10 = scalar_lea.hbm %s2875_s0, 32  ;;  %s2169_s20 = int_to_ptr.hbm [resolvable:$true] %s2168_s20 }
  0x26   : > { %s2170_s1 = scalar_lea.hbm %s2169_s20, 16  ;;  %p2172_p10 = pneg %p2430_p2 }
  0x27   : > { %p2171_p9 = scmp.ne.s32.totalorder %s2169_s20, %s2170_s1  ;;  %p2176_p0 = scmp.lt.s32.totalorder %s2169_s20, %s2875_s0 }
  0x28   : > { %p2177_p5 = scmp.lt.s32.totalorder %s2175_s10, %s2170_s1 }
  0x29   : > { %p2173_p12 = pnand %p2172_p10, %p2171_p9 }
  0x2a   : > { %p2178_p7 = por %p2177_p5, %p2176_p0 }
  0x2b   : > { %p2174_p13 = pneg %p2173_p12 }
  0x2d   : > { %p2179_p11 = pnand %p2178_p7, %p2174_p13 }
  0x2f   : > { %2182 = shalt.err (!%p2179_p11)
}
  0x30   : > { %s2280_s29 = smov 128   ;;  %s2281_s14 = smov 8  }
  0x31   : > { %1917 = dma.hbm_to_vmem [thread:$0]  (!%p2430_p2), %s290_s17, 256, %s292_s16, %s280_s19, %s2280_s29, %s2280_s29, %s2281_s14  }
  0x32   : > { %303 = sbr.rel (%p2376_p8) target bundleno = 1270 (0x4f6), region = 48  ;;  %s2447_s9 = sand.u32 (!%p2376_p8), 1, %s2264_s25  }
  0x33   : > { %s1822_s20 = sshll.u32 (!%p2376_p8), %s2447_s9, 4  ;;  %s306_s1 = scalar_lea.sflag (!%p2376_p8), [#allocation3], %s2447_s9 }
  0x34   : > { %s309_s15 = scalar_lea.vmem (!%p2376_p8), [#allocation2], %s1822_s20 }
  0x37   : > { %2243 = dma.done.wait (%p2363_p4), %s306_s1, 256  }
  0x38   : > { %2245 = vsyncadd (%p2363_p4), %s306_s1, 4294967040 }
  0x39   : > { %2247 = dma.done.wait (%p46_p1), [#allocation6], 272  }
  0x3a   : > { %2249 = vsyncadd (%p46_p1), [#allocation6], 4294967024 }
  0x3b   : > { %2251 = dma.done.wait (%p46_p1), [#allocation9], 272  }
  0x3c   : > { %2253 = vsyncadd (%p46_p1), [#allocation9], 4294967024  ;;  %v1877_v0 = vld [vmem:[#allocation5 + $0x8] sm:$0xff]  ;;  %v1876_v1 = vld [vmem:[#allocation5] sm:$0xff]  ;;  %vm385_vm0 = vcmask 261120   ;;  %s2282_s30 = smov 104  }
  0x3d   : > { %v362_v2 = vld [vmem:[%s309_s15] sm:$0xff]  ;;  %395 = vmatpush.bf16.msra.mxu0 %v1877_v0  ;;  %v363_v3 = vld [vmem:[%s309_s15 + $0x8] sm:$0xff]  ;;  %s2283_s12 = smov 120   ;;  %s2284_s16 = smov 112   ;;  %vm972_vm1 = vcmask 1043456   ;;  %vm458_vm2 = vcmask 1047556  }
  0x3e   : > { %v364_v4 = vpack.c.bf16 %v363_v3, %v362_v2  ;;  %v2013_v6 = vld [vmem:[#allocation7] ss:$0 sm:$0xff]  ;;  %v1879_v11 = vld [vmem:[#allocation8 + $0x8] sm:$0xff]  ;;  %v1878_v13 = vld [vmem:[#allocation8] sm:$0xff]  ;;  %v2285_v16 = vmov 1983009808  }
  0x3f   : > { %v934_v12 = vld [vmem:[%s2880_s5] sm:$0xf]  ;;  %429 = vmatpush.bf16.msra.mxu1 %v1879_v11  ;;  %v463_v17 = vunpack.c.l.s4 %v2285_v16  ;;  %v2286_v32 = vmov 1934713408   ;;  %vm959_vm3 = vcmask 64512   ;;  %vm1090_vm6 = vcmask 39936  }
  0x40   : > { %v974_v14 = vsel %vm972_vm1, %v934_v12, 0  ;;  %v487_v33 = vunpack.c.l.s4 %v2286_v32  ;;  %vm1222_vm14 = vcmask 130048   ;;  %s2289_s13 = smov 16   ;;  %s2290_s11 = smov 8  }
  0x41   : > { %396 = vmatpush.bf16.msra.mxu0 %v1876_v1  ;;  %983 = vmatpush.bf16.msra.mxu2 %v974_v14  ;;  %v2472_v27 = vunpack.c.0.s8 %v463_v17  ;;  %s2291_s29 = smov 24   ;;  %s360_s14 = scalar_lea.vmem [#allocation11], %s1822_s20 }
  0x42   : > { %v2483_v43 = vunpack.c.0.s8 %v487_v33  ;;  %s1880_s1 = sshll.u32 %s2354_s28, 4  ;;  %s1685_s28 = scalar_lea.sflag [#allocation4], %s2447_s9 }
  0x43   : > { %430 = vmatpush.bf16.msra.mxu1 %v1878_v13 }
  0x44   : > { %1836 = vmatmul.msk.bf16.vlgmr.msra.gmra.mxu0 %vm385_vm0, %v364_v4 }
  0x46   : > { %1845 = vmatmul.msk.bf16.vlgmr.msra.gmra.mxu1 %vm385_vm0, %v364_v4 }
  0xc1   : > { %v398_v5 = vpop.f32.mrf.mxu0 }
  0xc2   : > { %v399_v8 = vadd.f32 %v2013_v6, %v398_v5 }
  0xc4   : > { %v460_v38 = vrot.slane %v399_v8, 4 }
  0xc9   : > { %v400_v7 = vpop.f32.mrf.mxu0 }
  0xca   : > { %v401_v9 = vadd.f32 %v2013_v6, %v400_v7 }
  0xcc   : > { %v1993_v10 = vpack.i.bf16 %v401_v9, %v399_v8  ;;  %v516_v36 = vrot.slane %v401_v9, 4 }
  0xce   : > { %1994 = vrot.lane.b32.xlu1 %v1993_v10, %s2282_s30  ;;  %1984 = vrot.lane.b32.xlu0 %v1993_v10, %s2283_s12 }
  0xd6   : > { %1989 = vrot.lane.b32.xlu0 %v1993_v10, %s2284_s16 }
 0x140   : > { %v1995_v15 = vpop.permute.xlu1 %1994  ;;  %v1985_v18 = vpop.permute.xlu0 %1984 }
 0x141   : > { %v1997_v19 = vunpack.i.h.bf16 %v1995_v15  ;;  %v1996_v20 = vunpack.i.l.bf16 %v1995_v15  ;;  %v1987_v21 = vunpack.i.h.bf16 %v1985_v18  ;;  %v1986_v22 = vunpack.i.l.bf16 %v1985_v18 }
 0x143   : > { %v526_v23 = vrot.slane %v1997_v19, 4  ;;  %v470_v24 = vrot.slane %v1996_v20, 4  ;;  %v528_v25 = vrot.slane %v1987_v21, 4  ;;  %v472_v26 = vrot.slane %v1986_v22, 4 }
 0x145   : > { %v527_v28 = vsel %vm458_vm2, %v526_v23, %v1987_v21  ;;  %v473_v29 = vsel %vm458_vm2, %v1996_v20, %v472_v26  ;;  %v529_v30 = vsel %vm458_vm2, %v1997_v19, %v528_v25  ;;  %v471_v31 = vsel %vm458_vm2, %v470_v24, %v1986_v22 }
 0x146   : > { %v533_v34 = vperm.slane %v527_v28, %v2472_v27  ;;  %v481_v35 = vperm.slane %v473_v29, %v2472_v27  ;;  %v537_v39 = vperm.slane %v529_v30, %v2472_v27  ;;  %v477_v40 = vperm.slane %v471_v31, %v2472_v27 }
 0x148   : > { %v1990_v37 = vpop.permute.xlu0 %1989  ;;  %v538_v48 = vrot.slane %v533_v34, 4  ;;  %v494_v49 = vrot.slane %v481_v35, 4  ;;  %v550_v52 = vrot.slane %v537_v39, 4  ;;  %v482_v53 = vrot.slane %v477_v40, 4 }
 0x149   : > { %v1992_v41 = vunpack.i.h.bf16 %v1990_v37  ;;  %v1991_v42 = vunpack.i.l.bf16 %v1990_v37 }
 0x14b   : > { %v514_v44 = vrot.slane %v1992_v41, 4  ;;  %v517_v45 = vsel %vm458_vm2, %v1992_v41, %v516_v36  ;;  %v457_v46 = vrot.slane %v1991_v42, 4  ;;  %v461_v47 = vsel %vm458_vm2, %v1991_v42, %v460_v38 }
 0x14c   : > { %v525_v50 = vperm.slane %v517_v45, %v2472_v27  ;;  %v469_v51 = vperm.slane %v461_v47, %v2472_v27 }
 0x14d   : > { %v515_v54 = vsel %vm458_vm2, %v514_v44, %v401_v9  ;;  %v459_v55 = vsel %vm458_vm2, %v457_v46, %v399_v8 }
 0x14e   : > { %v521_v56 = vperm.slane %v515_v54, %v2472_v27  ;;  %v552_v57 = vrot.slane %v525_v50, 4  ;;  %v465_v58 = vperm.slane %v459_v55, %v2472_v27  ;;  %v495_v59 = vsel %vm458_vm2, %v494_v49, %v469_v51 }
 0x14f   : > { %v496_v60 = vrot.slane %v469_v51, 4  ;;  %v501_v61 = vperm.slane %v495_v59, %v2483_v43  ;;  %v551_v62 = vsel %vm458_vm2, %v550_v52, %v525_v50 }
 0x150   : > { %v540_v63 = vrot.slane %v521_v56, 4  ;;  %v483_v0 = vsel %vm458_vm2, %v482_v53, %v465_v58  ;;  %v484_v1 = vrot.slane %v465_v58, 4  ;;  %v539_v2 = vsel %vm458_vm2, %v538_v48, %v521_v56 }
 0x151   : > { %v489_v3 = vperm.slane %v483_v0, %v2483_v43  ;;  %v497_v4 = vsel %vm458_vm2, %v481_v35, %v496_v60  ;;  %v510_v5 = vrot.slane %v501_v61, 4  ;;  %v545_v6 = vperm.slane %v539_v2, %v2483_v43 }
 0x152   : > { %v485_v7 = vsel %vm458_vm2, %v477_v40, %v484_v1  ;;  %v505_v8 = vperm.slane %v497_v4, %v2483_v43  ;;  %v541_v9 = vsel %vm458_vm2, %v533_v34, %v540_v63  ;;  %v553_v10 = vsel %vm458_vm2, %v537_v39, %v552_v57 }
 0x153   : > { %v493_v11 = vperm.slane %v485_v7, %v2483_v43  ;;  %v506_v12 = vrot.slane %v489_v3, 4  ;;  %v549_v13 = vperm.slane %v541_v9, %v2483_v43  ;;  %v557_v15 = vperm.slane %v551_v62, %v2483_v43 }
 0x154   : > { %v512_v14 = vrot.slane %v505_v8, 4  ;;  %v561_v16 = vperm.slane %v553_v10, %v2483_v43  ;;  %v562_v17 = vrot.slane %v545_v6, 4  ;;  %v511_v20 = vsel %vm458_vm2, 0.0, %v510_v5 }
 0x155   : > { %v507_v18 = vsel %vm458_vm2, 0.0, %v506_v12  ;;  %v508_v19 = vrot.slane %v493_v11, 4  ;;  %v564_v21 = vrot.slane %v549_v13, 4  ;;  %v566_v24 = vrot.slane %v557_v15, 4 }
 0x156   : > { %v513_v22 = vsel %vm458_vm2, 0.0, %v512_v14  ;;  %v563_v23 = vsel %vm458_vm2, 0.0, %v562_v17  ;;  %v568_v25 = vrot.slane %v561_v16, 4  ;;  %v581_v30 = vsel %vm458_vm2, %v512_v14, %v501_v61 }
 0x157   : > { %v509_v26 = vsel %vm458_vm2, 0.0, %v508_v19  ;;  %v565_v28 = vsel %vm458_vm2, 0.0, %v564_v21  ;;  %v570_v29 = vsel %vm458_vm2, %v508_v19, %v489_v3  ;;  %v567_v31 = vsel %vm458_vm2, 0.0, %v566_v24 }
 0x158   : > { %v569_v32 = vsel %vm458_vm2, 0.0, %v568_v25  ;;  %v575_v33 = vrot.slane %v509_v26, 4  ;;  %v585_v34 = vperm.slane %v581_v30, %v2472_v27  ;;  %v586_v35 = vrot.slane %v513_v22, 4 }
 0x159   : > { %v624_v36 = vsel %vm458_vm2, %v564_v21, %v545_v6  ;;  %v629_v37 = vrot.slane %v565_v28, 4  ;;  %v635_v38 = vsel %vm458_vm2, %v568_v25, %v557_v15  ;;  %v640_v40 = vrot.slane %v569_v32, 4 }
 0x15a   : > { %v639_v39 = vperm.slane %v635_v38, %v2472_v27  ;;  %v574_v41 = vperm.slane %v570_v29, %v2472_v27  ;;  %v576_v42 = vsel %vm458_vm2, %v575_v33, %v507_v18  ;;  %v587_v44 = vsel %vm458_vm2, %v586_v35, %v511_v20 }
 0x15b   : > { %v580_v45 = vperm.slane %v576_v42, %v2472_v27  ;;  %v606_v46 = vrot.slane %v585_v34, 4  ;;  %v628_v47 = vperm.slane %v624_v36, %v2472_v27  ;;  %v641_v48 = vsel %vm458_vm2, %v640_v40, %v567_v31 }
 0x15c   : > { %v591_v49 = vperm.slane %v587_v44, %v2472_v27  ;;  %v594_v50 = vrot.slane %v574_v41, 4  ;;  %v630_v51 = vsel %vm458_vm2, %v629_v37, %v563_v23  ;;  %v645_v53 = vperm.slane %v641_v48, %v2472_v27 }
 0x15d   : > { %v634_v52 = vperm.slane %v630_v51, %v2472_v27  ;;  %v648_v54 = vrot.slane %v628_v47, 4  ;;  %v660_v55 = vrot.slane %v639_v39, 4  ;;  %v592_v58 = vrot.slane %v580_v45, 4 }
 0x15e   : > { %v595_v56 = vsel %vm458_vm2, %v580_v45, %v594_v50  ;;  %v607_v57 = vsel %vm458_vm2, %v591_v49, %v606_v46  ;;  %v604_v59 = vrot.slane %v591_v49, 4  ;;  %v658_v9 = vrot.slane %v645_v53, 4 }
 0x15f   : > { %v603_v60 = vperm.slane %v595_v56, %v2483_v43  ;;  %v615_v61 = vperm.slane %v607_v57, %v2483_v43  ;;  %v649_v62 = vsel %vm458_vm2, %v634_v52, %v648_v54  ;;  %v661_v63 = vsel %vm458_vm2, %v645_v53, %v660_v55  ;;  %v2015_v54 = vld [vmem:[%s2881_s6] ss:$0 sm:$0xff] }
 0x160   : > { %v657_v0 = vperm.slane %v649_v62, %v2483_v43  ;;  %v669_v1 = vperm.slane %v661_v63, %v2483_v43  ;;  %v593_v2 = vsel %vm458_vm2, %v592_v58, %v574_v41  ;;  %v605_v3 = vsel %vm458_vm2, %v604_v59, %v585_v34 }
 0x161   : > { %v620_v4 = vrot.slane %v615_v61, 4  ;;  %v599_v5 = vperm.slane %v593_v2, %v2483_v43  ;;  %v611_v6 = vperm.slane %v605_v3, %v2483_v43  ;;  %v646_v7 = vrot.slane %v634_v52, 4 }
 0x162   : > { %v674_v8 = vrot.slane %v669_v1, 4  ;;  %v622_v10 = vrot.slane %v603_v60, 4  ;;  %v676_v11 = vrot.slane %v657_v0, 4  ;;  %v659_v19 = vsel %vm458_vm2, %v658_v9, %v639_v39 }
 0x163   : > { %v621_v12 = vsel %vm458_vm2, %v620_v4, %v603_v60  ;;  %v616_v13 = vrot.slane %v611_v6, 4  ;;  %v647_v14 = vsel %vm458_vm2, %v646_v7, %v628_v47  ;;  %v618_v15 = vrot.slane %v599_v5, 4 }
 0x164   : > { %v675_v16 = vsel %vm458_vm2, %v674_v8, %v657_v0  ;;  %v682_v17 = vpack.c.bf16 %v621_v12, %v621_v12  ;;  %v653_v18 = vperm.slane %v647_v14, %v2483_v43  ;;  %v665_v22 = vperm.slane %v659_v19, %v2483_v43 }
 0x165   : > { %v683_v20 = vpack.c.bf16 %v675_v16, %v675_v16  ;;  %v617_v21 = vsel %vm458_vm2, %v616_v13, %v599_v5  ;;  %v623_v23 = vsel %vm458_vm2, %v615_v61, %v622_v10  ;;  %v677_v26 = vsel %vm458_vm2, %v669_v1, %v676_v11 }
 0x166   : > { %v951_v24 = vunpack.c.l.b16 %v682_v17  ;;  %v678_v25 = vpack.c.bf16 %v617_v21, %v617_v21  ;;  %v684_v28 = vpack.c.bf16 %v623_v23, %v623_v23  ;;  %v670_v30 = vrot.slane %v665_v22, 4 }
 0x167   : > { %v952_v29 = vunpack.c.l.b16 %v683_v20  ;;  %v685_v31 = vpack.c.bf16 %v677_v26, %v677_v26  ;;  %v619_v32 = vsel %vm458_vm2, %v611_v6, %v618_v15  ;;  %v672_v34 = vrot.slane %v653_v18, 4 }
 0x168   : > { %v953_v33 = vunpack.c.l.b16 %v684_v28  ;;  %v680_v35 = vpack.c.bf16 %v619_v32, %v619_v32  ;;  %v671_v37 = vsel %vm458_vm2, %v670_v30, %v653_v18  ;;  %v947_v40 = vunpack.c.l.b16 %v678_v25 }
 0x169   : > { %v957_v36 = vpack.c.b16 %v952_v29, %v951_v24  ;;  %v954_v38 = vunpack.c.l.b16 %v685_v31  ;;  %v679_v39 = vpack.c.bf16 %v671_v37, %v671_v37  ;;  %v673_v41 = vsel %vm458_vm2, %v665_v22, %v672_v34 }
 0x16a   : > { %v681_v45 = vpack.c.bf16 %v673_v41, %v673_v41  ;;  %v949_v46 = vunpack.c.l.b16 %v680_v35  ;;  %v2287_v57 = vmov -1.0   ;;  %v432_v41 = vpop.f32.mrf.mxu1 }
 0x16b   : > { %v967_v42 = vsel %vm959_vm3, %v957_v36, 0  ;;  %v958_v44 = vpack.c.b16 %v954_v38, %v953_v33  ;;  %v948_v47 = vunpack.c.l.b16 %v679_v39 }
 0x16c   : > { %1064 = vmatpush.bf16.xpose.msrb.mxu1 %v967_v42  ;;  %v950_v48 = vunpack.c.l.b16 %v681_v45 }
 0x16d   : > { %v955_v49 = vpack.c.b16 %v948_v47, %v947_v40  ;;  %v970_v50 = vsel %vm959_vm3, %v958_v44, 0 }
 0x16e   : > { %v956_v51 = vpack.c.b16 %v950_v48, %v949_v46 }
 0x16f   : > { %1846 = vmatmul.msk.bf16.vlgmr.msra.gmra.mxu2 %vm959_vm3, %v955_v49  ;;  %v961_v52 = vsel %vm959_vm3, %v955_v49, 0 }
 0x170   : > { %1036 = vmatpush.bf16.xpose.msra.mxu3 %v961_v52  ;;  %v964_v53 = vsel %vm959_vm3, %v956_v51, 0 }
 0x171   : > { %1050 = vmatpush.bf16.xpose.msrb.mxu0 %v964_v53 }
 0x173   : > { %1852 = vmatmul.msk.bf16.vlgmr.msrb.gmra.mxu1 %vm959_vm3, %v957_v36 }
 0x177   : > { %1850 = vmatmul.msk.bf16.vlgmr.msra.gmra.mxu3 %vm959_vm3, %v955_v49  ;;  %v2288_v49 = vmov 0.0  }
 0x178   : > { %1078 = vmatpush.bf16.xpose.msrb.mxu3 %v970_v50  ;;  %1851 = vmatmul.msk.bf16.vlgmr.msrb.gmra.mxu0 %vm959_vm3, %v956_v51 }
 0x17f   : > { %1847 = vmatmul.msk.bf16.gmra.mxu2 %vm959_vm3, %v956_v51 }
 0x187   : > { %1853 = vmatmul.msk.bf16.vlgmr.msrb.gmra.mxu3 %vm959_vm3, %v958_v44 }
 0x18f   : > { %1848 = vmatmul.msk.bf16.gmra.mxu2 %vm959_vm3, %v957_v36 }
 0x19f   : > { %1849 = vmatmul.msk.bf16.gmra.mxu2 %vm959_vm3, %v958_v44  ;;  %v434_v44 = vpop.f32.mrf.mxu1 }
 0x1f0   : > { %v1066_v46 = vpop.f32.mrf.mxu1 }
 0x1f2   : > { %v985_v55 = vpop.f32.mrf.mxu2 }
 0x1f3   : > { %v986_v56 = vadd.f32 %v2015_v54, %v985_v55 }
 0x1f5   : > { %vm1005_vm4 = vcmp.ge.f32.partialorder %v986_v56, 0.0  ;;  %v1052_v42 = vpop.f32.mrf.mxu0 }
 0x1f6   : > { %v1013_v58 = vsel %vm1005_vm4, 1.0, %v2287_v57 }
 0x1f7   : > { %v1021_v61 = vpack.c.bf16 %v1013_v58, %v1013_v58 }
 0x1f9   : > { %v1087_v0 = vunpack.c.l.b16 %v1021_v61 }
 0x1fa   : > { %v987_v59 = vpop.f32.mrf.mxu2  ;;  %v1038_v47 = vpop.f32.mrf.mxu3 }
 0x1fb   : > { %v988_v60 = vadd.f32 %v2015_v54, %v987_v59 }
 0x1fd   : > { %vm1006_vm5 = vcmp.ge.f32.partialorder %v988_v60, 0.0  ;;  %v1054_v45 = vpop.f32.mrf.mxu0 }
 0x1fe   : > { %v1014_v62 = vsel %vm1006_vm5, 1.0, %v2287_v57 }
 0x1ff   : > { %v1022_v63 = vpack.c.bf16 %v1014_v62, %v1014_v62 }
 0x201   : > { %v1088_v1 = vunpack.c.l.b16 %v1022_v63 }
 0x202   : > { %v990_v2 = vpop.f32.mrf.mxu2 }
 0x203   : > { %v1089_v3 = vpack.c.b16 %v1088_v1, %v1087_v0  ;;  %v991_v4 = vadd.f32 %v2015_v54, %v990_v2 }
 0x205   : > { %v1092_v5 = vsel %vm1090_vm6, %v1089_v3, 0  ;;  %vm1007_vm7 = vcmp.ge.f32.partialorder %v991_v4, 0.0 }
 0x206   : > { %1101 = vmatpush.bf16.xpose.msra.mxu0 %v1092_v5  ;;  %v1015_v6 = vsel %vm1007_vm7, 1.0, %v2287_v57 }
 0x207   : > { %v1023_v9 = vpack.c.bf16 %v1015_v6, %v1015_v6 }
 0x209   : > { %v1110_v12 = vunpack.c.l.b16 %v1023_v9 }
 0x20a   : > { %v992_v7 = vpop.f32.mrf.mxu2 }
 0x20b   : > { %v993_v8 = vadd.f32 %v2015_v54, %v992_v7 }
 0x20d   : > { %vm1008_vm8 = vcmp.ge.f32.partialorder %v993_v8, 0.0  ;;  %1854 = vmatmul.msk.bf16.vlgmr.msra.gmra.mxu0 %vm1090_vm6, %v1089_v3 }
 0x20e   : > { %v1016_v10 = vsel %vm1008_vm8, 1.0, %v2287_v57 }
 0x20f   : > { %v1024_v11 = vpack.c.bf16 %v1016_v10, %v1016_v10 }
 0x211   : > { %v1111_v13 = vunpack.c.l.b16 %v1024_v11 }
 0x212   : > { %v995_v14 = vpop.f32.mrf.mxu2 }
 0x213   : > { %v1112_v15 = vpack.c.b16 %v1111_v13, %v1110_v12  ;;  %v996_v16 = vadd.f32 %v2015_v54, %v995_v14 }
 0x215   : > { %v1114_v17 = vsel %vm1090_vm6, %v1112_v15, 0  ;;  %vm1009_vm9 = vcmp.ge.f32.partialorder %v996_v16, 0.0 }
 0x216   : > { %1123 = vmatpush.bf16.xpose.msra.mxu1 %v1114_v17  ;;  %v1017_v18 = vsel %vm1009_vm9, 1.0, %v2287_v57  ;;  %v2014_v17 = vld [vmem:[#allocation10] ss:$0 sm:$0xff]  ;;  %vm1679_vm9 = vcmask 195584  }
 0x217   : > { %v1025_v21 = vpack.c.bf16 %v1017_v18, %v1017_v18 }
 0x219   : > { %v1132_v24 = vunpack.c.l.b16 %v1025_v21  ;;  %v2599_v21 = vadd.f32 %v2014_v17, %v432_v41 }
 0x21a   : > { %v997_v19 = vpop.f32.mrf.mxu2 }
 0x21b   : > { %v998_v20 = vadd.f32 %v2015_v54, %v997_v19 }
 0x21d   : > { %vm1010_vm10 = vcmp.ge.f32.partialorder %v998_v20, 0.0  ;;  %1855 = vmatmul.msk.bf16.vlgmr.msra.gmra.mxu1 %vm1090_vm6, %v1112_v15 }
 0x21e   : > { %v1018_v22 = vsel %vm1010_vm10, 1.0, %v2287_v57 }
 0x21f   : > { %v1026_v23 = vpack.c.bf16 %v1018_v22, %v1018_v22  ;;  %v2601_v22 = vadd.f32 %v2014_v17, %v434_v44 }
 0x221   : > { %v1133_v25 = vunpack.c.l.b16 %v1026_v23 }
 0x222   : > { %v1000_v26 = vpop.f32.mrf.mxu2 }
 0x223   : > { %v1134_v28 = vpack.c.b16 %v1133_v25, %v1132_v24  ;;  %v1001_v29 = vadd.f32 %v2015_v54, %v1000_v26 }
 0x225   : > { %v1136_v30 = vsel %vm1090_vm6, %v1134_v28, 0  ;;  %vm1011_vm11 = vcmp.ge.f32.partialorder %v1001_v29, 0.0 }
 0x226   : > { %1145 = vmatpush.bf16.xpose.msra.mxu3 %v1136_v30  ;;  %v1019_v31 = vsel %vm1011_vm11, 1.0, %v2287_v57  ;;  %v2008_v30 = vpack.i.bf16 %v2601_v22, %v2599_v21 }
 0x227   : > { %v1027_v34 = vpack.c.bf16 %v1019_v31, %v1019_v31 }
 0x229   : > { %v1154_v37 = vunpack.c.l.b16 %v1027_v34 }
 0x22a   : > { %v1002_v32 = vpop.f32.mrf.mxu2 }
 0x22b   : > { %v1003_v33 = vadd.f32 %v2015_v54, %v1002_v32  ;;  %v1068_v54 = vpop.f32.mrf.mxu1 }
 0x22d   : > { %vm1012_vm12 = vcmp.ge.f32.partialorder %v1003_v33, 0.0  ;;  %1856 = vmatmul.msk.bf16.vlgmr.msra.gmra.mxu3 %vm1090_vm6, %v1134_v28 }
 0x22e   : > { %v1020_v35 = vsel %vm1012_vm12, 1.0, %v2287_v57  ;;  %v1040_v57 = vpop.f32.mrf.mxu3 }
 0x22f   : > { %v1028_v36 = vpack.c.bf16 %v1020_v35, %v1020_v35 }
 0x231   : > { %v1155_v38 = vunpack.c.l.b16 %v1028_v36 }
 0x233   : > { %v1156_v39 = vpack.c.b16 %v1155_v38, %v1154_v37 }
 0x235   : > { %v1158_v40 = vsel %vm1090_vm6, %v1156_v39, 0 }
 0x236   : > { %1167 = vmatpush.bf16.xpose.msrb.mxu0 %v1158_v40  ;;  %v1080_v2 = vpop.f32.mrf.mxu3 }
 0x23d   : > { %1857 = vmatmul.msk.bf16.vlgmr.msrb.gmra.mxu0 %vm1090_vm6, %v1156_v39 }
 0x23e   : > { %v1082_v10 = vpop.f32.mrf.mxu3 }
 0x28a   : > { %v1103_v48 = vpop.f32.mrf.mxu0 }
 0x28b   : > { %vm1174_vm13 = vcmp.lt.f32.partialorder %v1103_v48, 4.5 }
 0x28c   : > { %v1858_v50 = vsel %vm1174_vm13, 1.0, %v2288_v49 }
 0x28d   : > { %v1198_v51 = vsub.f32 31.0, %v1858_v50 }
 0x28f   : > { %v1206_v52 = vmul.f32 0.17677669, %v1198_v51 }
 0x291   : > { %v2581_v53 = vmul.f32 %v1206_v52, %v1038_v47 }
 0x292   : > { %v1105_v55 = vpop.f32.mrf.mxu0 }
 0x293   : > { %vm1175_vm15 = vcmp.lt.f32.partialorder %v1105_v55, 4.5  ;;  %v1223_v56 = vsel %vm1222_vm14, %v2581_v53, -inf }
 0x294   : > { %v1859_v58 = vsel %vm1175_vm15, 1.0, %v2288_v49  ;;  %1224 = vmax.xlane.f32.xlu2 %v1223_v56 }
 0x295   : > { %v1199_v59 = vsub.f32 31.0, %v1859_v58 }
 0x297   : > { %v1207_v60 = vmul.f32 0.17677669, %v1199_v59 }
 0x299   : > { %v2586_v61 = vmul.f32 %v1207_v60, %v1040_v57 }
 0x29a   : > { %v1125_v62 = vpop.f32.mrf.mxu1 }
 0x29b   : > { %vm1176_vm1 = vcmp.lt.f32.partialorder %v1125_v62, 4.5  ;;  %v1226_v63 = vsel %vm1222_vm14, %v2586_v61, -inf }
 0x29c   : > { %v1860_v0 = vsel %vm1176_vm1, 1.0, %v2288_v49  ;;  %1227 = vmax.xlane.f32.xlu2 %v1226_v63 }
 0x29d   : > { %v1200_v1 = vsub.f32 31.0, %v1860_v0 }
 0x29f   : > { %v1208_v3 = vmul.f32 0.17677669, %v1200_v1 }
 0x2a1   : > { %v1216_v4 = vmul.f32 %v1208_v3, %v1052_v42 }
 0x2a2   : > { %v1127_v5 = vpop.f32.mrf.mxu1 }
 0x2a3   : > { %vm1177_vm4 = vcmp.lt.f32.partialorder %v1127_v5, 4.5  ;;  %v1229_v6 = vsel %vm1222_vm14, %v1216_v4, -inf }
 0x2a4   : > { %v1861_v7 = vsel %vm1177_vm4, 1.0, %v2288_v49  ;;  %1230 = vmax.xlane.f32.xlu2 %v1229_v6 }
 0x2a5   : > { %v1201_v8 = vsub.f32 31.0, %v1861_v7 }
 0x2a7   : > { %v1209_v9 = vmul.f32 0.17677669, %v1201_v8 }
 0x2a9   : > { %v1217_v11 = vmul.f32 %v1209_v9, %v1054_v45 }
 0x2ab   : > { %v1232_v12 = vsel %vm1222_vm14, %v1217_v11, -inf }
 0x2ac   : > { %1233 = vmax.xlane.f32.xlu0 %v1232_v12 }
 0x2b0   : > { %v1147_v13 = vpop.f32.mrf.mxu3 }
 0x2b1   : > { %vm1178_vm5 = vcmp.lt.f32.partialorder %v1147_v13, 4.5 }
 0x2b2   : > { %v1862_v14 = vsel %vm1178_vm5, 1.0, %v2288_v49 }
 0x2b3   : > { %v1202_v15 = vsub.f32 31.0, %v1862_v14 }
 0x2b5   : > { %v1210_v16 = vmul.f32 0.17677669, %v1202_v15 }
 0x2b7   : > { %v2595_v18 = vmul.f32 %v1210_v16, %v1066_v46 }
 0x2b8   : > { %v1149_v19 = vpop.f32.mrf.mxu3 }
 0x2b9   : > { %vm1179_vm6 = vcmp.lt.f32.partialorder %v1149_v19, 4.5  ;;  %v1235_v20 = vsel %vm1222_vm14, %v2595_v18, -inf  ;;  %v708_v19 = vrot.slane %v2599_v21, 4 }
 0x2ba   : > { %v1863_v23 = vsel %vm1179_vm6, 1.0, %v2288_v49  ;;  %v1169_v24 = vpop.f32.mrf.mxu0  ;;  %1236 = vmax.xlane.f32.xlu1 %v1235_v20  ;;  %v764_v20 = vrot.slane %v2601_v22, 4 }
 0x2bb   : > { %v1203_v25 = vsub.f32 31.0, %v1863_v23  ;;  %vm1180_vm7 = vcmp.lt.f32.partialorder %v1169_v24, 4.5 }
 0x2bc   : > { %v1864_v26 = vsel %vm1180_vm7, 1.0, %v2288_v49 }
 0x2bd   : > { %v1211_v28 = vmul.f32 0.17677669, %v1203_v25  ;;  %v1204_v29 = vsub.f32 31.0, %v1864_v26 }
 0x2bf   : > { %v1219_v31 = vmul.f32 %v1211_v28, %v1068_v54  ;;  %v1212_v32 = vmul.f32 0.17677669, %v1204_v29 }
 0x2c0   : > { %2009 = vrot.lane.b32.xlu0 %v2008_v30, %s2282_s30 }
 0x2c1   : > { %v1238_v33 = vsel %vm1222_vm14, %v1219_v31, -inf  ;;  %v1220_v37 = vmul.f32 %v1212_v32, %v1080_v2 }
 0x2c2   : > { %v1171_v34 = vpop.f32.mrf.mxu0  ;;  %1239 = vmax.xlane.f32.xlu2 %v1238_v33 }
 0x2c3   : > { %vm1181_vm8 = vcmp.lt.f32.partialorder %v1171_v34, 4.5  ;;  %v1241_v39 = vsel %vm1222_vm14, %v1220_v37, -inf }
 0x2c4   : > { %v1865_v35 = vsel %vm1181_vm8, 1.0, %v2288_v49 }
 0x2c5   : > { %v1205_v36 = vsub.f32 31.0, %v1865_v35 }
 0x2c7   : > { %v1213_v38 = vmul.f32 0.17677669, %v1205_v36 }
 0x2c9   : > { %v2611_v40 = vmul.f32 %v1213_v38, %v1082_v10 }
 0x2ca   : > { %1242 = vmax.xlane.f32.xlu2 %v1241_v39 }
 0x2cb   : > { %v1244_v41 = vsel %vm1222_vm14, %v2611_v40, -inf }
 0x2d2   : > { %1245 = vmax.xlane.f32.xlu2 %v1244_v41 }
 0x2d3   : > { %2004 = vrot.lane.b32.xlu1 %v2008_v30, %s2284_s16  ;;  %s1697_s16 = sshll.u32 %s360_s14, 4  ;;  %s1698_s16 = int_to_ptr.vmem [resolvable:$true] %s1697_s16 }
 0x2ea   : > { %1999 = vrot.lane.b32.xlu2 %v2008_v30, %s2283_s12  ;;  %s1696_s12 = scalar_lea.hbm %s2882_s7, %s1880_s1 }
 0x2eb   : > { %s1699_s17 = sshll.u32 %s1696_s12, 4  ;;  %s1700_s17 = int_to_ptr.hbm [resolvable:$true] %s1699_s17 }
 0x2ec   : > { %s2212_s20 = sshra.s32 %s1700_s17, 4  ;;  %s2213_s20 = int_to_ptr.hbm [resolvable:$true] %s2212_s20 }
 0x2ed   : > { %s2214_s21 = scalar_lea.hbm %s2213_s20, 16  ;;  %p2219_p11 = scmp.lt.s32.totalorder %s2213_s20, %s2882_s7 }
 0x2ee   : > { %p2215_p1 = scmp.ne.s32.totalorder %s2213_s20, %s2214_s21 }
 0x2f0   : > { %p2216_p4 = pnand %p2215_p1, %p2417_p3 }
 0x2f2   : > { %p2217_p8 = pneg %p2216_p4 }
 0x307   : > { %v1225_v42 = vpop.xlane.xlu2 %1224 }
 0x308   : > { %v1247_v44 = vsub.f32 %v2581_v53, %v1225_v42 }
 0x30a   : > { %v1255_v45 = vmul.f32 1.442695, %v1247_v44 }
 0x30c   : > { %2016 = vpow2.f32 %v1255_v45 }
 0x30f   : > { %v1228_v46 = vpop.xlane.xlu2 %1227 }
 0x310   : > { %v1248_v51 = vsub.f32 %v2586_v61, %v1228_v46 }
 0x312   : > { %v2618_v47 = vpop.eup %2016  ;;  %v1257_v54 = vmul.f32 1.442695, %v1248_v51 }
 0x313   : > { %v1271_v48 = vsel %vm1222_vm14, %v2618_v47, 0.0 }
 0x314   : > { %1272 = vadd.xlane.f32.xlu1 %v1271_v48 }
 0x317   : > { %v1231_v49 = vpop.xlane.xlu2 %1230 }
 0x318   : > { %v1249_v50 = vsub.f32 %v1216_v4, %v1231_v49 }
 0x31a   : > { %v1259_v52 = vmul.f32 1.442695, %v1249_v50 }
 0x31c   : > { %2018 = vpow2.f32 %v1259_v52 }
 0x31d   : > { %2020 = vpow2.f32 %v1257_v54 }
 0x31f   : > { %v1234_v55 = vpop.xlane.xlu0 %1233 }
 0x320   : > { %v1250_v56 = vsub.f32 %v1217_v11, %v1234_v55 }
 0x322   : > { %v2623_v57 = vpop.eup %2018  ;;  %v1261_v53 = vmul.f32 1.442695, %v1250_v56 }
 0x323   : > { %v1277_v58 = vsel %vm1222_vm14, %v2623_v57, 0.0  ;;  %v2627_v59 = vpop.eup %2020 }
 0x324   : > { %2022 = vpow2.f32 %v1261_v53  ;;  %1278 = vadd.xlane.f32.xlu0 %v1277_v58  ;;  %v1274_v61 = vsel %vm1222_vm14, %v2627_v59, 0.0 }
 0x32a   : > { %v2629_v60 = vpop.eup %2022 }
 0x32b   : > { %v1280_v62 = vsel %vm1222_vm14, %v2629_v60, 0.0 }
 0x32c   : > { %1275 = vadd.xlane.f32.xlu0 %v1274_v61  ;;  %1281 = vadd.xlane.f32.xlu2 %v1280_v62 }
 0x32d   : > { %v1237_v63 = vpop.xlane.xlu1 %1236 }
 0x32e   : > { %v1251_v0 = vsub.f32 %v2595_v18, %v1237_v63 }
 0x330   : > { %v1263_v1 = vmul.f32 1.442695, %v1251_v0 }
 0x332   : > { %2024 = vpow2.f32 %v1263_v1  ;;  %v2010_v14 = vpop.permute.xlu0 %2009 }
 0x333   : > { %v2012_v25 = vunpack.i.h.bf16 %v2010_v14  ;;  %v2011_v26 = vunpack.i.l.bf16 %v2010_v14 }
 0x335   : > { %v1240_v2 = vpop.xlane.xlu2 %1239  ;;  %v774_v34 = vrot.slane %v2012_v25, 4  ;;  %v718_v35 = vrot.slane %v2011_v26, 4 }
 0x336   : > { %v1252_v3 = vsub.f32 %v1219_v31, %v1240_v2 }
 0x338   : > { %v2636_v4 = vpop.eup %2024  ;;  %v1265_v5 = vmul.f32 1.442695, %v1252_v3 }
 0x339   : > { %v1283_v6 = vsel %vm1222_vm14, %v2636_v4, 0.0 }
 0x33a   : > { %2026 = vpow2.f32 %v1265_v5  ;;  %1284 = vadd.xlane.f32.xlu2 %v1283_v6 }
 0x33d   : > { %v1243_v7 = vpop.xlane.xlu2 %1242 }
 0x33e   : > { %v1253_v8 = vsub.f32 %v1220_v37, %v1243_v7 }
 0x340   : > { %v2640_v9 = vpop.eup %2026  ;;  %v1267_v10 = vmul.f32 1.442695, %v1253_v8 }
 0x341   : > { %v1286_v11 = vsel %vm1222_vm14, %v2640_v9, 0.0 }
 0x342   : > { %2028 = vpow2.f32 %v1267_v10  ;;  %1287 = vadd.xlane.f32.xlu1 %v1286_v11 }
 0x345   : > { %v2005_v12 = vpop.permute.xlu1 %2004  ;;  %v1246_v13 = vpop.xlane.xlu2 %1245 }
 0x346   : > { %v2007_v15 = vunpack.i.h.bf16 %v2005_v12  ;;  %v2006_v16 = vunpack.i.l.bf16 %v2005_v12  ;;  %v1254_v17 = vsub.f32 %v2611_v40, %v1246_v13 }
 0x348   : > { %v2645_v18 = vpop.eup %2028  ;;  %v762_v23 = vrot.slane %v2007_v15, 4  ;;  %v706_v24 = vrot.slane %v2006_v16, 4  ;;  %v1269_v28 = vmul.f32 1.442695, %v1254_v17  ;;  %v765_v31 = vsel %vm458_vm2, %v2007_v15, %v764_v20 }
 0x349   : > { %v1289_v29 = vsel %vm1222_vm14, %v2645_v18, 0.0  ;;  %v709_v33 = vsel %vm458_vm2, %v2006_v16, %v708_v19  ;;  %v773_v37 = vperm.slane %v765_v31, %v2472_v27 }
 0x34a   : > { %v763_v30 = vsel %vm458_vm2, %v762_v23, %v2601_v22  ;;  %1290 = vadd.xlane.f32.xlu2 %v1289_v29  ;;  %v707_v32 = vsel %vm458_vm2, %v706_v24, %v2599_v21  ;;  %2030 = vpow2.f32 %v1269_v28  ;;  %v717_v22 = vperm.slane %v709_v33, %v2472_v27 }
 0x34b   : > { %v769_v36 = vperm.slane %v763_v30, %v2472_v27  ;;  %v713_v39 = vperm.slane %v707_v32, %v2472_v27  ;;  %v800_v48 = vrot.slane %v773_v37, 4 }
 0x34c   : > { %v744_v54 = vrot.slane %v717_v22, 4 }
 0x34d   : > { %v2000_v38 = vpop.permute.xlu2 %1999  ;;  %v788_v46 = vrot.slane %v769_v36, 4  ;;  %v732_v52 = vrot.slane %v713_v39, 4 }
 0x34e   : > { %v2002_v40 = vunpack.i.h.bf16 %v2000_v38  ;;  %v2001_v41 = vunpack.i.l.bf16 %v2000_v38 }
 0x350   : > { %v775_v42 = vsel %vm458_vm2, %v774_v34, %v2002_v40  ;;  %v776_v44 = vrot.slane %v2002_v40, 4  ;;  %v719_v21 = vsel %vm458_vm2, %v718_v35, %v2001_v41  ;;  %v720_v45 = vrot.slane %v2001_v41, 4  ;;  %v2665_v51 = vpop.eup %2030 }
 0x351   : > { %v781_v49 = vperm.slane %v775_v42, %v2472_v27  ;;  %v725_v50 = vperm.slane %v719_v21, %v2472_v27  ;;  %v1292_v2 = vsel %vm1222_vm14, %v2665_v51, 0.0 }
 0x352   : > { %v777_v55 = vsel %vm458_vm2, %v2012_v25, %v776_v44  ;;  %v721_v56 = vsel %vm458_vm2, %v2011_v26, %v720_v45  ;;  %1293 = vadd.xlane.f32.xlu1 %v1292_v2 }
 0x353   : > { %v785_v53 = vperm.slane %v777_v55, %v2472_v27  ;;  %v786_v58 = vrot.slane %v781_v49, 4  ;;  %v789_v61 = vsel %vm458_vm2, %v781_v49, %v788_v46  ;;  %v729_v62 = vperm.slane %v721_v56, %v2472_v27 }
 0x354   : > { %v797_v63 = vperm.slane %v789_v61, %v2483_v43  ;;  %v730_v0 = vrot.slane %v725_v50, 4  ;;  %v733_v1 = vsel %vm458_vm2, %v725_v50, %v732_v52 }
 0x355   : > { %v787_v3 = vsel %vm458_vm2, %v786_v58, %v769_v36  ;;  %v798_v5 = vrot.slane %v785_v53, 4  ;;  %v801_v6 = vsel %vm458_vm2, %v785_v53, %v800_v48  ;;  %v741_v7 = vperm.slane %v733_v1, %v2483_v43 }
 0x356   : > { %v793_v8 = vperm.slane %v787_v3, %v2483_v43  ;;  %v809_v10 = vperm.slane %v801_v6, %v2483_v43  ;;  %v812_v11 = vrot.slane %v797_v63, 4  ;;  %v731_v12 = vsel %vm458_vm2, %v730_v0, %v713_v39 }
 0x357   : > { %v799_v13 = vsel %vm458_vm2, %v798_v5, %v773_v37  ;;  %v737_v14 = vperm.slane %v731_v12, %v2483_v43  ;;  %v742_v15 = vrot.slane %v729_v62, 4  ;;  %v745_v16 = vsel %vm458_vm2, %v729_v62, %v744_v54 }
 0x358   : > { %v805_v17 = vperm.slane %v799_v13, %v2483_v43  ;;  %v810_v19 = vrot.slane %v793_v8, 4  ;;  %v813_v20 = vsel %vm458_vm2, 0.0, %v812_v11  ;;  %v816_v23 = vrot.slane %v809_v10, 4 }
 0x359   : > { %v872_v24 = vsel %vm458_vm2, %v812_v11, %v793_v8  ;;  %v877_v25 = vrot.slane %v813_v20, 4  ;;  %v743_v26 = vsel %vm458_vm2, %v742_v15, %v717_v22  ;;  %v753_v28 = vperm.slane %v745_v16, %v2483_v43 }
 0x35a   : > { %v811_v29 = vsel %vm458_vm2, 0.0, %v810_v19  ;;  %v814_v30 = vrot.slane %v805_v17, 4  ;;  %v817_v31 = vsel %vm458_vm2, 0.0, %v816_v23  ;;  %v876_v32 = vperm.slane %v872_v24, %v2472_v27 }
 0x35b   : > { %v878_v33 = vsel %vm458_vm2, %v877_v25, %v811_v29  ;;  %v883_v34 = vsel %vm458_vm2, %v816_v23, %v805_v17  ;;  %v888_v35 = vrot.slane %v817_v31, 4  ;;  %v749_v36 = vperm.slane %v743_v26, %v2483_v43 }
 0x35c   : > { %v815_v37 = vsel %vm458_vm2, 0.0, %v814_v30  ;;  %v882_v38 = vperm.slane %v878_v33, %v2472_v27  ;;  %v887_v39 = vperm.slane %v883_v34, %v2472_v27  ;;  %v896_v22 = vrot.slane %v876_v32, 4 }
 0x35d   : > { %v754_v40 = vrot.slane %v737_v14, 4  ;;  %v756_v41 = vrot.slane %v741_v7, 4  ;;  %v758_v42 = vrot.slane %v749_v36, 4  ;;  %v760_v44 = vrot.slane %v753_v28, 4 }
 0x35e   : > { %v889_v21 = vsel %vm458_vm2, %v888_v35, %v815_v37  ;;  %v897_v45 = vsel %vm458_vm2, %v882_v38, %v896_v22  ;;  %v908_v46 = vrot.slane %v887_v39, 4  ;;  %v894_v48 = vrot.slane %v882_v38, 4 }
 0x35f   : > { %v755_v49 = vsel %vm458_vm2, 0.0, %v754_v40  ;;  %v757_v50 = vsel %vm458_vm2, 0.0, %v756_v41  ;;  %v759_v52 = vsel %vm458_vm2, 0.0, %v758_v42  ;;  %v761_v54 = vsel %vm458_vm2, 0.0, %v760_v44 }
 0x360   : > { %v818_v55 = vsel %vm458_vm2, %v756_v41, %v737_v14  ;;  %v823_v56 = vrot.slane %v757_v50, 4  ;;  %v829_v53 = vsel %vm458_vm2, %v760_v44, %v749_v36  ;;  %v834_v58 = vrot.slane %v761_v54, 4 }
 0x361   : > { %v822_v61 = vperm.slane %v818_v55, %v2472_v27  ;;  %v833_v62 = vperm.slane %v829_v53, %v2472_v27  ;;  %v893_v63 = vperm.slane %v889_v21, %v2472_v27  ;;  %v905_v0 = vperm.slane %v897_v45, %v2483_v43 }
 0x362   : > { %v824_v1 = vsel %vm458_vm2, %v823_v56, %v755_v49  ;;  %v835_v2 = vsel %vm458_vm2, %v834_v58, %v759_v52  ;;  %v895_v3 = vsel %vm458_vm2, %v894_v48, %v876_v32 }
 0x363   : > { %v828_v5 = vperm.slane %v824_v1, %v2472_v27  ;;  %v842_v6 = vrot.slane %v822_v61, 4  ;;  %v839_v7 = vperm.slane %v835_v2, %v2472_v27  ;;  %v854_v8 = vrot.slane %v833_v62, 4 }
 0x364   : > { %v909_v10 = vsel %vm458_vm2, %v893_v63, %v908_v46  ;;  %v924_v11 = vrot.slane %v905_v0, 4  ;;  %v901_v12 = vperm.slane %v895_v3, %v2483_v43  ;;  %v906_v13 = vrot.slane %v893_v63, 4 }
 0x365   : > { %v843_v14 = vsel %vm458_vm2, %v828_v5, %v842_v6  ;;  %v855_v15 = vsel %vm458_vm2, %v839_v7, %v854_v8  ;;  %v917_v16 = vperm.slane %v909_v10, %v2483_v43  ;;  %v840_v17 = vrot.slane %v828_v5, 4 }
 0x366   : > { %v851_v19 = vperm.slane %v843_v14, %v2483_v43  ;;  %v863_v20 = vperm.slane %v855_v15, %v2483_v43  ;;  %v852_v23 = vrot.slane %v839_v7, 4  ;;  %v907_v24 = vsel %vm458_vm2, %v906_v13, %v887_v39 }
 0x367   : > { %v925_v25 = vsel %vm458_vm2, %v917_v16, %v924_v11  ;;  %v841_v26 = vsel %vm458_vm2, %v840_v17, %v822_v61  ;;  %v913_v28 = vperm.slane %v907_v24, %v2483_v43  ;;  %v920_v29 = vrot.slane %v901_v12, 4 }
 0x368   : > { %v870_v30 = vrot.slane %v851_v19, 4  ;;  %v933_v31 = vpack.c.bf16 %v925_v25, %v925_v25  ;;  %v847_v32 = vperm.slane %v841_v26, %v2483_v43  ;;  %v853_v33 = vsel %vm458_vm2, %v852_v23, %v833_v62 }
 0x369   : > { %v859_v34 = vperm.slane %v853_v33, %v2483_v43  ;;  %v921_v35 = vsel %vm458_vm2, %v913_v28, %v920_v29  ;;  %v868_v36 = vrot.slane %v863_v20, 4  ;;  %v922_v37 = vrot.slane %v917_v16, 4 }
 0x36a   : > { %v871_v38 = vsel %vm458_vm2, %v863_v20, %v870_v30  ;;  %v1411_v39 = vunpack.c.l.b16 %v933_v31  ;;  %v866_v22 = vrot.slane %v847_v32, 4  ;;  %v929_v40 = vpack.c.bf16 %v921_v35, %v921_v35 }
 0x36b   : > { %v932_v41 = vpack.c.bf16 %v871_v38, %v871_v38  ;;  %v869_v42 = vsel %vm458_vm2, %v868_v36, %v851_v19  ;;  %v923_v44 = vsel %vm458_vm2, %v922_v37, %v905_v0  ;;  %v864_v21 = vrot.slane %v859_v34, 4 }
 0x36c   : > { %v867_v45 = vsel %vm458_vm2, %v859_v34, %v866_v22  ;;  %v1355_v46 = vunpack.c.l.b16 %v929_v40  ;;  %v930_v48 = vpack.c.bf16 %v869_v42, %v869_v42  ;;  %v931_v49 = vpack.c.bf16 %v923_v44, %v923_v44 }
 0x36d   : > { %v1410_v50 = vunpack.c.l.b16 %v932_v41  ;;  %v928_v52 = vpack.c.bf16 %v867_v45, %v867_v45  ;;  %v865_v54 = vsel %vm458_vm2, %v864_v21, %v847_v32  ;;  %v918_v55 = vrot.slane %v913_v28, 4 }
 0x36e   : > { %v1382_v56 = vunpack.c.l.b16 %v930_v48  ;;  %v1383_v53 = vunpack.c.l.b16 %v931_v49  ;;  %v926_v58 = vpack.c.bf16 %v865_v54, %v865_v54 }
 0x36f   : > { %v1412_v61 = vpack.c.b16 %v1411_v39, %v1410_v50  ;;  %v1354_v62 = vunpack.c.l.b16 %v928_v52  ;;  %v919_v63 = vsel %vm458_vm2, %v918_v55, %v901_v12 }
 0x370   : > { %v1384_v1 = vpack.c.b16 %v1383_v53, %v1382_v56  ;;  %v927_v0 = vpack.c.bf16 %v919_v63, %v919_v63  ;;  %v1326_v2 = vunpack.c.l.b16 %v926_v58 }
 0x371   : > { %1424 = vmatpush.bf16.msra.mxu0 %v1412_v61  ;;  %v1356_v3 = vpack.c.b16 %v1355_v46, %v1354_v62 }
 0x372   : > { %1396 = vmatpush.bf16.msrb.mxu2 %v1384_v1  ;;  %v1327_v5 = vunpack.c.l.b16 %v927_v0 }
 0x373   : > { %1368 = vmatpush.bf16.msrb.mxu3 %v1356_v3 }
 0x374   : > { %v1328_v6 = vpack.c.b16 %v1327_v5, %v1326_v2 }
 0x376   : > { %1340 = vmatpush.bf16.msrb.mxu1 %v1328_v6 }
 0x387   : > { %v1273_v7 = vpop.xlane.xlu1 %1272 }
 0x388   : > { %2032 = vrcp.f32 %v1273_v7 }
 0x38e   : > { %v2033_v13 = vpop.eup %2032 }
 0x38f   : > { %v1303_v12 = vmul.f32 %v2033_v13, %v2618_v47 }
 0x391   : > { %v1311_v19 = vpack.c.bf16 %v1303_v12, %v1303_v12 }
 0x393   : > { %v1321_v28 = vunpack.c.l.b16 %v1311_v19 }
 0x397   : > { %v1279_v8 = vpop.xlane.xlu0 %1278 }
 0x398   : > { %2034 = vrcp.f32 %v1279_v8 }
 0x39e   : > { %v2035_v14 = vpop.eup %2034 }
 0x39f   : > { %v1276_v10 = vpop.xlane.xlu0 %1275  ;;  %v1282_v11 = vpop.xlane.xlu2 %1281  ;;  %v1305_v15 = vmul.f32 %v2035_v14, %v2623_v57 }
 0x3a0   : > { %2036 = vrcp.f32 %v1276_v10 }
 0x3a1   : > { %2038 = vrcp.f32 %v1282_v11  ;;  %v1313_v23 = vpack.c.bf16 %v1305_v15, %v1305_v15 }
 0x3a3   : > { %v1349_v30 = vunpack.c.l.b16 %v1313_v23 }
 0x3a6   : > { %v2037_v16 = vpop.eup %2036 }
 0x3a7   : > { %v2039_v17 = vpop.eup %2038  ;;  %v1304_v20 = vmul.f32 %v2037_v16, %v2627_v59 }
 0x3a8   : > { %v1306_v24 = vmul.f32 %v2039_v17, %v2629_v60 }
 0x3a9   : > { %v1312_v25 = vpack.c.bf16 %v1304_v20, %v1304_v20 }
 0x3aa   : > { %v1314_v26 = vpack.c.bf16 %v1306_v24, %v1306_v24 }
 0x3ab   : > { %v1322_v29 = vunpack.c.l.b16 %v1312_v25 }
 0x3ac   : > { %v1350_v31 = vunpack.c.l.b16 %v1314_v26 }
 0x3ad   : > { %v1323_v32 = vpack.c.b16 %v1322_v29, %v1321_v28  ;;  %v1285_v33 = vpop.xlane.xlu2 %1284 }
 0x3ae   : > { %v1351_v34 = vpack.c.b16 %v1350_v31, %v1349_v30  ;;  %2040 = vrcp.f32 %v1285_v33 }
 0x3af   : > { %1866 = vmatmul.msk.bf16.vlgmr.msrb.gmra.mxu1 %vm1222_vm14, %v1323_v32 }
 0x3b0   : > { %1867 = vmatmul.msk.bf16.vlgmr.msrb.gmra.mxu3 %vm1222_vm14, %v1351_v34 }
 0x3b4   : > { %v2041_v57 = vpop.eup %2040 }
 0x3b5   : > { %v1288_v47 = vpop.xlane.xlu1 %1287  ;;  %v1307_v59 = vmul.f32 %v2041_v57, %v2636_v4 }
 0x3b6   : > { %2042 = vrcp.f32 %v1288_v47 }
 0x3b7   : > { %v1315_v35 = vpack.c.bf16 %v1307_v59, %v1307_v59 }
 0x3b9   : > { %v1377_v39 = vunpack.c.l.b16 %v1315_v35 }
 0x3bc   : > { %v2043_v60 = vpop.eup %2042 }
 0x3bd   : > { %v1308_v36 = vmul.f32 %v2043_v60, %v2640_v9  ;;  %v1291_v38 = vpop.xlane.xlu2 %1290 }
 0x3be   : > { %2044 = vrcp.f32 %v1291_v38 }
 0x3bf   : > { %v1316_v37 = vpack.c.bf16 %v1308_v36, %v1308_v36 }
 0x3c1   : > { %v1378_v22 = vunpack.c.l.b16 %v1316_v37 }
 0x3c3   : > { %v1379_v40 = vpack.c.b16 %v1378_v22, %v1377_v39 }
 0x3c4   : > { %v2045_v42 = vpop.eup %2044 }
 0x3c5   : > { %1868 = vmatmul.msk.bf16.vlgmr.msrb.gmra.mxu2 %vm1222_vm14, %v1379_v40  ;;  %v1294_v41 = vpop.xlane.xlu1 %1293  ;;  %v1309_v44 = vmul.f32 %v2045_v42, %v2645_v18 }
 0x3c6   : > { %2046 = vrcp.f32 %v1294_v41 }
 0x3c7   : > { %v1317_v45 = vpack.c.bf16 %v1309_v44, %v1309_v44 }
 0x3c9   : > { %v1405_v48 = vunpack.c.l.b16 %v1317_v45 }
 0x3cc   : > { %v2047_v21 = vpop.eup %2046 }
 0x3cd   : > { %v1310_v4 = vmul.f32 %v2047_v21, %v2665_v51 }
 0x3cf   : > { %v1318_v46 = vpack.c.bf16 %v1310_v4, %v1310_v4 }
 0x3d1   : > { %v1406_v9 = vunpack.c.l.b16 %v1318_v46 }
 0x3d3   : > { %v1407_v49 = vpack.c.b16 %v1406_v9, %v1405_v48 }
 0x3d5   : > { %1869 = vmatmul.msk.bf16.vlgmr.msra.gmra.mxu0 %vm1222_vm14, %v1407_v49 }
 0x42c   : > { %v1342_v50 = vpop.f32.mrf.mxu1 }
 0x42d   : > { %v1433_v55 = vrot.slane %v1342_v50, 4 }
 0x433   : > { %v1370_v56 = vpop.f32.mrf.mxu3 }
 0x434   : > { %v1344_v53 = vpop.f32.mrf.mxu1  ;;  %v1445_v1 = vrot.slane %v1370_v56, 4 }
 0x435   : > { %v1489_v63 = vrot.slane %v1344_v53, 4 }
 0x43b   : > { %v1372_v19 = vpop.f32.mrf.mxu3 }
 0x43c   : > { %v1501_v30 = vrot.slane %v1372_v19, 4 }
 0x448   : > { %v1398_v52 = vpop.f32.mrf.mxu2 }
 0x449   : > { %v1431_v54 = vrot.slane %v1398_v52, 4  ;;  %v1434_v58 = vsel %vm458_vm2, %v1398_v52, %v1433_v55 }
 0x44a   : > { %v1442_v51 = vperm.slane %v1434_v58, %v2472_v27 }
 0x44b   : > { %v1432_v18 = vsel %vm458_vm2, %v1431_v54, %v1342_v50 }
 0x44c   : > { %v1438_v0 = vperm.slane %v1432_v18, %v2472_v27  ;;  %v1469_v8 = vrot.slane %v1442_v51, 4 }
 0x44e   : > { %v1457_v11 = vrot.slane %v1438_v0, 4 }
 0x450   : > { %v1400_v61 = vpop.f32.mrf.mxu2 }
 0x451   : > { %v1487_v62 = vrot.slane %v1400_v61, 4  ;;  %v1490_v2 = vsel %vm458_vm2, %v1400_v61, %v1489_v63 }
 0x452   : > { %v1426_v3 = vpop.f32.mrf.mxu0  ;;  %v1498_v13 = vperm.slane %v1490_v2, %v2472_v27 }
 0x453   : > { %v1488_v5 = vsel %vm458_vm2, %v1487_v62, %v1344_v53  ;;  %v1443_v6 = vrot.slane %v1426_v3, 4  ;;  %v1446_v7 = vsel %vm458_vm2, %v1426_v3, %v1445_v1 }
 0x454   : > { %v1454_v10 = vperm.slane %v1446_v7, %v2472_v27  ;;  %v1494_v12 = vperm.slane %v1488_v5, %v2472_v27  ;;  %v1525_v32 = vrot.slane %v1498_v13, 4 }
 0x455   : > { %v1444_v14 = vsel %vm458_vm2, %v1443_v6, %v1370_v56 }
 0x456   : > { %v1450_v15 = vperm.slane %v1444_v14, %v2472_v27  ;;  %v1467_v16 = vrot.slane %v1454_v10, 4  ;;  %v1470_v17 = vsel %vm458_vm2, %v1454_v10, %v1469_v8  ;;  %v1513_v31 = vrot.slane %v1494_v12, 4 }
 0x457   : > { %v1478_v20 = vperm.slane %v1470_v17, %v2483_v43 }
 0x458   : > { %v1455_v23 = vrot.slane %v1450_v15, 4  ;;  %v1458_v24 = vsel %vm458_vm2, %v1450_v15, %v1457_v11  ;;  %v1468_v25 = vsel %vm458_vm2, %v1467_v16, %v1442_v51 }
 0x459   : > { %v1466_v26 = vperm.slane %v1458_v24, %v2483_v43  ;;  %v1474_v28 = vperm.slane %v1468_v25, %v2483_v43  ;;  %v1485_v29 = vrot.slane %v1478_v20, 4 }
 0x45a   : > { %v1456_v33 = vsel %vm458_vm2, %v1455_v23, %v1438_v0  ;;  %v1428_v34 = vpop.f32.mrf.mxu0 }
 0x45b   : > { %v1462_v47 = vperm.slane %v1456_v33, %v2483_v43  ;;  %v1481_v57 = vrot.slane %v1466_v26, 4  ;;  %v1483_v59 = vrot.slane %v1474_v28, 4  ;;  %v1486_v60 = vsel %vm458_vm2, 0.0, %v1485_v29 }
 0x45c   : > { %v1554_v35 = vsel %vm458_vm2, %v1485_v29, %v1474_v28  ;;  %v1559_v36 = vrot.slane %v1486_v60, 4  ;;  %v1499_v37 = vrot.slane %v1428_v34, 4  ;;  %v1502_v38 = vsel %vm458_vm2, %v1428_v34, %v1501_v30 }
 0x45d   : > { %v1479_v39 = vrot.slane %v1462_v47, 4  ;;  %v1482_v22 = vsel %vm458_vm2, 0.0, %v1481_v57  ;;  %v1484_v40 = vsel %vm458_vm2, 0.0, %v1483_v59  ;;  %v1558_v41 = vperm.slane %v1554_v35, %v2472_v27 }
 0x45e   : > { %v1548_v42 = vrot.slane %v1482_v22, 4  ;;  %v1500_v44 = vsel %vm458_vm2, %v1499_v37, %v1372_v19  ;;  %v1510_v21 = vperm.slane %v1502_v38, %v2472_v27  ;;  %v1543_v45 = vsel %vm458_vm2, %v1481_v57, %v1462_v47 }
 0x45f   : > { %v1506_v4 = vperm.slane %v1500_v44, %v2472_v27  ;;  %v1480_v46 = vsel %vm458_vm2, 0.0, %v1479_v39  ;;  %v1547_v48 = vperm.slane %v1543_v45, %v2472_v27  ;;  %v1560_v9 = vsel %vm458_vm2, %v1559_v36, %v1484_v40 }
 0x460   : > { %v1523_v49 = vrot.slane %v1510_v21, 4  ;;  %v1526_v50 = vsel %vm458_vm2, %v1510_v21, %v1525_v32  ;;  %v1549_v52 = vsel %vm458_vm2, %v1548_v42, %v1480_v46  ;;  %v1564_v54 = vperm.slane %v1560_v9, %v2472_v27 }
 0x461   : > { %v1511_v55 = vrot.slane %v1506_v4, 4  ;;  %v1514_v56 = vsel %vm458_vm2, %v1506_v4, %v1513_v31  ;;  %v1534_v53 = vperm.slane %v1526_v50, %v2483_v43  ;;  %v1553_v58 = vperm.slane %v1549_v52, %v2472_v27 }
 0x462   : > { %v1522_v61 = vperm.slane %v1514_v56, %v2483_v43  ;;  %v1524_v18 = vsel %vm458_vm2, %v1523_v49, %v1498_v13  ;;  %v1567_v62 = vrot.slane %v1547_v48, 4  ;;  %v1579_v63 = vrot.slane %v1558_v41, 4 }
 0x463   : > { %v1512_v51 = vsel %vm458_vm2, %v1511_v55, %v1494_v12  ;;  %v1530_v1 = vperm.slane %v1524_v18, %v2483_v43  ;;  %v1541_v0 = vrot.slane %v1534_v53, 4  ;;  %v1565_v2 = vrot.slane %v1553_v58, 4 }
 0x464   : > { %v1518_v3 = vperm.slane %v1512_v51, %v2483_v43  ;;  %v1537_v5 = vrot.slane %v1522_v61, 4  ;;  %v1568_v6 = vsel %vm458_vm2, %v1553_v58, %v1567_v62  ;;  %v1580_v7 = vsel %vm458_vm2, %v1564_v54, %v1579_v63 }
 0x465   : > { %v1539_v8 = vrot.slane %v1530_v1, 4  ;;  %v1542_v10 = vsel %vm458_vm2, 0.0, %v1541_v0  ;;  %v1608_v11 = vsel %vm458_vm2, %v1541_v0, %v1530_v1  ;;  %v1576_v13 = vperm.slane %v1568_v6, %v2483_v43 }
 0x466   : > { %v1535_v14 = vrot.slane %v1518_v3, 4  ;;  %v1538_v12 = vsel %vm458_vm2, 0.0, %v1537_v5  ;;  %v1612_v15 = vperm.slane %v1608_v11, %v2472_v27  ;;  %v1613_v16 = vrot.slane %v1542_v10, 4 }
 0x467   : > { %v1540_v17 = vsel %vm458_vm2, 0.0, %v1539_v8  ;;  %v1602_v19 = vrot.slane %v1538_v12, 4  ;;  %v1588_v20 = vperm.slane %v1580_v7, %v2483_v43  ;;  %v1566_v23 = vsel %vm458_vm2, %v1565_v2, %v1547_v48 }
 0x468   : > { %v1572_v24 = vperm.slane %v1566_v23, %v2483_v43  ;;  %v1577_v25 = vrot.slane %v1564_v54, 4  ;;  %v1536_v26 = vsel %vm458_vm2, 0.0, %v1535_v14  ;;  %v1597_v28 = vsel %vm458_vm2, %v1537_v5, %v1518_v3 }
 0x469   : > { %v1593_v29 = vrot.slane %v1588_v20, 4  ;;  %v1601_v30 = vperm.slane %v1597_v28, %v2472_v27  ;;  %v1603_v31 = vsel %vm458_vm2, %v1602_v19, %v1536_v26  ;;  %v1614_v32 = vsel %vm458_vm2, %v1613_v16, %v1540_v17 }
 0x46a   : > { %v1578_v33 = vsel %vm458_vm2, %v1577_v25, %v1558_v41  ;;  %v1591_v34 = vrot.slane %v1572_v24, 4  ;;  %v1607_v47 = vperm.slane %v1603_v31, %v2472_v27  ;;  %v1618_v57 = vperm.slane %v1614_v32, %v2472_v27 }
 0x46b   : > { %v1594_v59 = vsel %vm458_vm2, %v1593_v29, %v1576_v13  ;;  %v1584_v60 = vperm.slane %v1578_v33, %v2483_v43  ;;  %v1621_v35 = vrot.slane %v1601_v30, 4  ;;  %v1633_v36 = vrot.slane %v1612_v15, 4 }
 0x46c   : > { %1661 = vrot.lane.b32.xlu1 %v1594_v59, %s2289_s13  ;;  %v1619_v37 = vrot.slane %v1607_v47, 4  ;;  %v1631_v38 = vrot.slane %v1618_v57, 4  ;;  %v1595_v55 = vrot.slane %v1576_v13, 4 }
 0x46d   : > { %v1589_v39 = vrot.slane %v1584_v60, 4  ;;  %v1592_v22 = vsel %vm458_vm2, %v1584_v60, %v1591_v34  ;;  %v1634_v40 = vsel %vm458_vm2, %v1618_v57, %v1633_v36  ;;  %v1622_v27 = vsel %vm458_vm2, %v1607_v47, %v1621_v35 }
 0x46e   : > { %1653 = vrot.lane.b32.xlu0 %v1592_v22, %s2290_s11  ;;  %v1642_v41 = vperm.slane %v1634_v40, %v2483_v43  ;;  %v1620_v42 = vsel %vm458_vm2, %v1619_v37, %v1601_v30  ;;  %v1632_v44 = vsel %vm458_vm2, %v1631_v38, %v1612_v15  ;;  %v1630_v46 = vperm.slane %v1622_v27, %v2483_v43 }
 0x46f   : > { %v1626_v21 = vperm.slane %v1620_v42, %v2483_v43  ;;  %v1638_v45 = vperm.slane %v1632_v44, %v2483_v43  ;;  %v1590_v4 = vsel %vm458_vm2, %v1589_v39, %v1572_v24  ;;  %v1596_v53 = vsel %vm458_vm2, %v1588_v20, %v1595_v55 }
 0x470   : > { %v1647_v48 = vrot.slane %v1642_v41, 4  ;;  %v1649_v56 = vrot.slane %v1630_v46, 4 }
 0x471   : > { %v1643_v9 = vrot.slane %v1638_v45, 4  ;;  %v1645_v49 = vrot.slane %v1626_v21, 4 }
 0x472   : > { %v1648_v54 = vsel %vm458_vm2, %v1647_v48, %v1630_v46  ;;  %v1650_v43 = vsel %vm458_vm2, %v1642_v41, %v1649_v56 }
 0x473   : > { %v1646_v50 = vsel %vm458_vm2, %v1638_v45, %v1645_v49  ;;  %v1644_v52 = vsel %vm458_vm2, %v1643_v9, %v1626_v21 }
 0x474   : > { %1655 = vrot.lane.b32.xlu2 %v1646_v50, %s2290_s11 }
 0x476   : > { %1663 = vrot.lane.b32.xlu0 %v1648_v54, %s2289_s13  ;;  %s2218_s13 = scalar_lea.hbm %s2882_s7, 32 }
 0x477   : > { %p2220_p2 = scmp.lt.s32.totalorder %s2218_s13, %s2214_s21 }
 0x479   : > { %p2221_p9 = por %p2220_p2, %p2219_p11 }
 0x47b   : > { %p2222_p10 = pnand %p2221_p9, %p2217_p8 }
 0x47c   : > { %1669 = vrot.lane.b32.xlu2 %v1596_v53, %s2291_s29 }
 0x47e   : > { %1671 = vrot.lane.b32.xlu0 %v1650_v43, %s2291_s29 }
 0x4ce   : > { %v1656_v58 = vpop.permute.xlu2 %1655 }
 0x4cf   : > { %v1676_v2 = vsel %vm959_vm3, %v1644_v52, %v1656_v58 }
 0x4d6   : > { %v1670_v63 = vpop.permute.xlu2 %1669 }
 0x4de   : > { %v1662_v18 = vpop.permute.xlu1 %1661 }
 0x4e0   : > { %v1654_v61 = vpop.permute.xlu0 %1653 }
 0x4e1   : > { %v1675_v62 = vsel %vm959_vm3, %v1590_v4, %v1654_v61 }
 0x4e2   : > { %v1677_v51 = vsel %vm1222_vm14, %v1675_v62, %v1662_v18 }
 0x4e3   : > { %v1680_v1 = vsel %vm1679_vm9, %v1677_v51, %v1670_v63 }
 0x4e4   : > { %1682 = vst.msk [vmem:[%s360_s14] sm:$0xff] %vm385_vm0, %v1680_v1 }
 0x4e8   : > { %v1664_v0 = vpop.permute.xlu0 %1663 }
 0x4e9   : > { %v1678_v3 = vsel %vm1222_vm14, %v1676_v2, %v1664_v0 }
 0x4f0   : > { %v1672_v5 = vpop.permute.xlu0 %1671 }
 0x4f1   : > { %v1681_v6 = vsel %vm1679_vm9, %v1678_v3, %v1672_v5 }
 0x4f2   : > { %1683 = vst.msk [vmem:[%s360_s14 + $0x8] sm:$0xff] %vm385_vm0, %v1681_v6 }
 0x4f3   : > { %2225 = shalt.err (!%p2222_p10)
}
 0x4f4   : > { %s2292_s9 = smov 128  }
 0x4f5   : > { %1899 = dma.vmem_to_hbm [thread:$0]  (%p2417_p3), %s1698_s16, 256, %s1700_s17, %s1685_s28, %s2292_s9, %s2292_s9, %s2290_s11  }
 0x4f6 PF: > { %s1714_s14 = sand.u32 1, %s2260_s24   ;;  %p2891_p12 = scmp.ge.s32.totalorder %s2272_s27, 2 }
 0x4f7   : > { %s1715_s15 = scalar_lea.sflag [#allocation4], %s1714_s14 }
 0x4f8   : > { %p1919_p13 = pnand %p2891_p12, %p2368_p6 }
 0x4fa   : > { %p1920_p0 = pneg %p1919_p13 }
 0x4fc   : > { %2255 = dma.done.wait (%p1920_p0), %s1715_s15, 256  }
 0x4fd   : > { %2257 = vsyncadd (%p1920_p0), %s1715_s15, 4294967040  ;;  %p22_p5 = scmp.ge.s32.totalorder %s2407_s18, 4   ;;  %s2892_s24 = smov %s2264_s25 }
 0x4fe   : > { %s2893_s25 = smov %s2268_s26  ;;  %s2894_s26 = smov %s2423_s23 }
 0x4ff   : > { %s2895_s27 = smov %s2407_s18  ;;  %24 = sbr.rel (!%p22_p5) target bundleno = 9 (0x9), region = 109 }
 0x504   :  { %1721 = vsyncpa [#allocation3], 1 }
 0x505   :  { %1723 = vsyncpa [#allocation3 + $0x1], 1 }
 0x506   :  { %1724 = vsyncpa [#allocation6], 1 }
 0x507   :  { %1725 = vsyncpa [#allocation9], 1 }
 0x508   :  { %1726 = vsyncpa [#allocation4], 1 }
 0x509   :  { %1728 = vsyncpa [#allocation4 + $0x1], 1 }

</bundles_post_ra>
